<compile_context>
chip_gen: v6e
topology: v6e:2x2x1
jax: 0.10.0
libtpu: 0.0.40
codegen_flags: <defaults>
</compile_context>

<pallas_src>
import math
import functools

import jax
import jax.numpy as jnp
from jax.experimental import pallas as pl
from jax.experimental.pallas import tpu as pltpu


# ----------------------------------------------------------------------------
# Fused encoder-stack + decoder kernel (one grid step == one encoder layer)
# ----------------------------------------------------------------------------
def _layernorm(x, g, b, eps):
    mean = jnp.mean(x, axis=-1, keepdims=True)
    xc = x - mean
    var = jnp.mean(xc * xc, axis=-1, keepdims=True)       # biased, like torch
    return xc * jax.lax.rsqrt(var + eps) * g + b


def transformer_kernel(x_in_ref, mask_ref,
                       wq_ref, wk_ref, wv_ref,
                       bq_ref, bk_ref, bv_ref,
                       wo_ref, bo_ref,
                       ln1g_ref, ln1b_ref,
                       w1_ref, b1_ref, w2_ref, b2_ref,
                       ln2g_ref, ln2b_ref,
                       decw_ref, decb_ref,
                       out_ref,
                       x_scr, attn_scr,
                       *, seq_len, batch, nhead, eps):
    L = seq_len
    layer = pl.program_id(0)
    nlayers = pl.num_programs(0)

    # Load the embedded+PE input into the VMEM carry on the first layer only.
    @pl.when(layer == 0)
    def _():
        x_scr[...] = x_in_ref[...]

    x = x_scr[...]                              # (N*L, E) f32, batch-major rows
    E = x.shape[-1]
    hd = E // nhead
    scale = 1.0 / math.sqrt(hd)
    mask = mask_ref[...]                        # (L, L) additive causal mask

    # ---- multi-head self-attention, fused with the output projection -------
    for n in range(batch):                      # tiny, unrolled at trace time
        xn = x[n * L:(n + 1) * L, :]            # (L, E) f32, sublane-aligned
        xb = xn.astype(jnp.bfloat16)
        acc = jnp.zeros((L, E), jnp.float32)
        for h in range(nhead):
            q = jnp.dot(xb, wq_ref[h], preferred_element_type=jnp.float32) + bq_ref[h]
            k = jnp.dot(xb, wk_ref[h], preferred_element_type=jnp.float32) + bk_ref[h]
            v = jnp.dot(xb, wv_ref[h], preferred_element_type=jnp.float32) + bv_ref[h]
            s = jax.lax.dot_general(
                q.astype(jnp.bfloat16), k.astype(jnp.bfloat16),
                dimension_numbers=(((1,), (1,)), ((), ())),
                preferred_element_type=jnp.float32) * scale
            s = s + mask
            s = s - jnp.max(s, axis=-1, keepdims=True)
            p = jnp.exp(s)
            p = p * pl.reciprocal(jnp.sum(p, axis=-1, keepdims=True), approx=True)
            o = jnp.dot(p.astype(jnp.bfloat16), v.astype(jnp.bfloat16),
                        preferred_element_type=jnp.float32)             # (L, hd)
            # fold the out-projection per head: sum_h o_h @ Wo_h
            acc = acc + jnp.dot(o.astype(jnp.bfloat16), wo_ref[h],
                                preferred_element_type=jnp.float32)     # (L, E)
        attn_scr[n * L:(n + 1) * L, :] = acc + bo_ref[...]

    # ---- residual + LN1, FFN, residual + LN2 on the whole (N*L, E) slab -----
    y = _layernorm(x + attn_scr[...], ln1g_ref[...], ln1b_ref[...], eps)
    yb = y.astype(jnp.bfloat16)
    h1 = jnp.maximum(
        jnp.dot(yb, w1_ref[...], preferred_element_type=jnp.float32) + b1_ref[...],
        0.0)
    f = jnp.dot(h1.astype(jnp.bfloat16), w2_ref[...],
                preferred_element_type=jnp.float32) + b2_ref[...]
    out = _layernorm(y + f, ln2g_ref[...], ln2b_ref[...], eps)
    x_scr[...] = out                            # carry to next layer

    # ---- final decoder projection, only after the last encoder layer --------
    @pl.when(layer == nlayers - 1)
    def _():
        out_ref[...] = (jnp.dot(out.astype(jnp.bfloat16), decw_ref[...],
                                preferred_element_type=jnp.float32)
                        + decb_ref[...])


def fused_encoder_decoder(x2d, mask, p, *, nlayers, nhead, seq_len, batch):
    M, E = x2d.shape
    hd = E // nhead
    nhid = p["w1"].shape[-1]
    tpad = p["dec_w"].shape[-1]

    def lmap3(l): return (l, 0, 0)
    def lmap4(l): return (l, 0, 0, 0)
    def cmap2(l): return (0, 0)

    w_head = pl.BlockSpec((None, nhead, E, hd), lmap4)
    b_head = pl.BlockSpec((None, nhead, 1, hd), lmap4)
    vec_e = pl.BlockSpec((None, 1, E), lmap3)

    in_specs = [
        pl.BlockSpec((M, E), cmap2),                  # x_in (fetched once)
        pl.BlockSpec((seq_len, seq_len), cmap2),      # causal mask
        w_head, w_head, w_head,                       # wq, wk, wv
        b_head, b_head, b_head,                       # bq, bk, bv
        pl.BlockSpec((None, nhead, hd, E), lmap4),    # wo
        vec_e,                                        # bo
        vec_e, vec_e,                                 # ln1 gamma / beta
        pl.BlockSpec((None, E, nhid), lmap3),         # w1
        pl.BlockSpec((None, 1, nhid), lmap3),         # b1
        pl.BlockSpec((None, nhid, E), lmap3),         # w2
        vec_e,                                        # b2
        vec_e, vec_e,                                 # ln2 gamma / beta
        pl.BlockSpec((E, tpad), cmap2),               # decoder weight
        pl.BlockSpec((1, tpad), cmap2),               # decoder bias
    ]

    kern = functools.partial(transformer_kernel, seq_len=seq_len, batch=batch,
                             nhead=nhead, eps=1e-5)

    return pl.pallas_call(
        kern,
        out_shape=jax.ShapeDtypeStruct((M, tpad), jnp.float32),
        grid_spec=pltpu.PrefetchScalarGridSpec(
            num_scalar_prefetch=0,
            grid=(nlayers,),
            in_specs=in_specs,
            out_specs=pl.BlockSpec((M, tpad), cmap2),
            scratch_shapes=[pltpu.VMEM((M, E), jnp.float32),   # activation carry
                            pltpu.VMEM((M, E), jnp.float32)]), # attention output
        compiler_params=pltpu.CompilerParams(
            dimension_semantics=("arbitrary",)),               # layers are serial
    )(x2d, mask,
      p["wq"], p["wk"], p["wv"], p["bq"], p["bk"], p["bv"],
      p["wo"], p["bo"], p["ln1_g"], p["ln1_b"],
      p["w1"], p["b1"], p["w2"], p["b2"], p["ln2_g"], p["ln2_b"],
      p["dec_w"], p["dec_b"])


# ----------------------------------------------------------------------------
# Parameters (deterministic synthetic init; weights pre-transposed to (in,out),
# attention weights pre-split per head, matmul weights stored in bf16)
# ----------------------------------------------------------------------------
def make_pe(max_len, d_model):
    position = jnp.arange(max_len, dtype=jnp.float32)[:, None]
    div_term = jnp.exp(jnp.arange(0, d_model, 2, dtype=jnp.float32)
                       * (-math.log(10000.0) / d_model))
    pe = jnp.zeros((max_len, d_model), jnp.float32)
    pe = pe.at[:, 0::2].set(jnp.sin(position * div_term))
    pe = pe.at[:, 1::2].set(jnp.cos(position * div_term))
    return pe                                     # (max_len, d_model)


def init_params(key, ntoken, ninp, nhead, nhid, nlayers, max_len=64):
    E, H = ninp, nhid
    hd = E // nhead
    tpad = ((ntoken + 127) // 128) * 128          # lane-dense decoder output
    ks = jax.random.split(key, 9)

    def unif(k, shape, bound, dtype=jnp.float32):
        return jax.random.uniform(k, shape, jnp.float32, -bound, bound).astype(dtype)

    b_attn = 1.0 / math.sqrt(E)
    b_ffn1 = 1.0 / math.sqrt(E)
    b_ffn2 = 1.0 / math.sqrt(H)

    dec_w = jnp.zeros((E, tpad), jnp.float32)
    dec_w = dec_w.at[:, :ntoken].set(unif(ks[1], (E, ntoken), 0.1))

    return {
        "emb":   unif(ks[0], (ntoken, E), 0.1),
        "pe":    make_pe(max_len, E),
        "dec_w": dec_w.astype(jnp.bfloat16),
        "dec_b": jnp.zeros((1, tpad), jnp.float32),
        # stacked per-layer encoder weights
        "wq": unif(ks[2], (nlayers, nhead, E, hd), b_attn, jnp.bfloat16),
        "wk": unif(ks[3], (nlayers, nhead, E, hd), b_attn, jnp.bfloat16),
        "wv": unif(ks[4], (nlayers, nhead, E, hd), b_attn, jnp.bfloat16),
        "bq": jnp.zeros((nlayers, nhead, 1, hd), jnp.float32),
        "bk": jnp.zeros((nlayers, nhead, 1, hd), jnp.float32),
        "bv": jnp.zeros((nlayers, nhead, 1, hd), jnp.float32),
        "wo": unif(ks[5], (nlayers, nhead, hd, E), b_attn, jnp.bfloat16),
        "bo": jnp.zeros((nlayers, 1, E), jnp.float32),
        "w1": unif(ks[6], (nlayers, E, H), b_ffn1, jnp.bfloat16),
        "b1": unif(ks[7], (nlayers, 1, H), b_ffn1),
        "w2": unif(ks[8], (nlayers, H, E), b_ffn2, jnp.bfloat16),
        "b2": unif(ks[8], (nlayers, 1, E), b_ffn2),
        "ln1_g": jnp.ones((nlayers, 1, E), jnp.float32),
        "ln1_b": jnp.zeros((nlayers, 1, E), jnp.float32),
        "ln2_g": jnp.ones((nlayers, 1, E), jnp.float32),
        "ln2_b": jnp.zeros((nlayers, 1, E), jnp.float32),
    }


# ----------------------------------------------------------------------------
# Forward pass (TransformerModel.forward, eval mode — dropout = identity)
# ----------------------------------------------------------------------------
def transformer_forward(params, src, src_mask, *, ninp, nhead, ntoken, nlayers):
    L, N = src.shape
    E = ninp
    # embedding * sqrt(ninp) + positional encoding, laid out batch-major
    x = jnp.take(params["emb"], src.T, axis=0) * math.sqrt(ninp)   # (N, L, E)
    x = x + params["pe"][:L][None, :, :]
    x2d = x.reshape(N * L, E)

    logits2d = fused_encoder_decoder(x2d, src_mask, params,
                                     nlayers=nlayers, nhead=nhead,
                                     seq_len=L, batch=N)           # (N*L, Tpad)
    # back to PyTorch's seq-first (L, N, ntoken) layout
    return logits2d[:, :ntoken].reshape(N, L, ntoken).transpose(1, 0, 2)


def generate_square_subsequent_mask(sz):
    # 0 on/below diagonal, -inf strictly above (same as the PyTorch helper)
    return jnp.triu(jnp.full((sz, sz), float("-inf"), jnp.float32), k=1)


# ----------------------------------------------------------------------------
if __name__ == "__main__":
    ntoken, ninp, nhead, nhid, nlayers = 50, 32, 4, 64, 2
    L, N = 8, 2   # (seq, batch)

    key = jax.random.PRNGKey(0)
    k_src, k_params = jax.random.split(key)

    src = jax.random.randint(k_src, (L, N), 0, ntoken, dtype=jnp.int32)
    src_mask = generate_square_subsequent_mask(L)
    params = init_params(k_params, ntoken, ninp, nhead, nhid, nlayers)

    fwd = jax.jit(functools.partial(transformer_forward, ninp=ninp, nhead=nhead,
                                    ntoken=ntoken, nlayers=nlayers))
    out = fwd(params, src, src_mask)
    jax.block_until_ready(out)

    assert out.shape == (L, N, ntoken), out.shape
    assert bool(jnp.all(jnp.isfinite(out)))
    print("KERNEL_OK")
</pallas_src>

<mosaic_0001>
module attributes {stable_mosaic.version = 11 : i64} {
  func.func @transformer_kernel(%arg0: i32, %arg1: memref<16x32xf32, #tpu.memory_space<vmem>>, %arg2: memref<8x8xf32, #tpu.memory_space<vmem>>, %arg3: memref<1x4x32x8xbf16, #tpu.memory_space<vmem>>, %arg4: memref<1x4x32x8xbf16, #tpu.memory_space<vmem>>, %arg5: memref<1x4x32x8xbf16, #tpu.memory_space<vmem>>, %arg6: memref<1x4x1x8xf32, #tpu.memory_space<vmem>>, %arg7: memref<1x4x1x8xf32, #tpu.memory_space<vmem>>, %arg8: memref<1x4x1x8xf32, #tpu.memory_space<vmem>>, %arg9: memref<1x4x8x32xbf16, #tpu.memory_space<vmem>>, %arg10: memref<1x1x32xf32, #tpu.memory_space<vmem>>, %arg11: memref<1x1x32xf32, #tpu.memory_space<vmem>>, %arg12: memref<1x1x32xf32, #tpu.memory_space<vmem>>, %arg13: memref<1x32x64xbf16, #tpu.memory_space<vmem>>, %arg14: memref<1x1x64xf32, #tpu.memory_space<vmem>>, %arg15: memref<1x64x32xbf16, #tpu.memory_space<vmem>>, %arg16: memref<1x1x32xf32, #tpu.memory_space<vmem>>, %arg17: memref<1x1x32xf32, #tpu.memory_space<vmem>>, %arg18: memref<1x1x32xf32, #tpu.memory_space<vmem>>, %arg19: memref<32x128xbf16, #tpu.memory_space<vmem>>, %arg20: memref<1x128xf32, #tpu.memory_space<vmem>>, %arg21: memref<16x128xf32, #tpu.memory_space<vmem>>, %arg22: memref<16x32xf32, #tpu.memory_space<vmem>>, %arg23: memref<16x32xf32, #tpu.memory_space<vmem>>) attributes {dimension_semantics = [#tpu.dimension_semantics<arbitrary>], iteration_bounds = array<i64: 2>, scalar_prefetch = 0 : i64, scratch_operands = 2 : i64, tpu.core_type = #tpu.core_type<tc>, window_params = [{pipeline_mode = #tpu.pipeline_mode<synchronous>, transform_indices = @transform_0, window_bounds = array<i64: 16, 32>}, {pipeline_mode = #tpu.pipeline_mode<synchronous>, transform_indices = @transform_1, window_bounds = array<i64: 8, 8>}, {transform_indices = @transform_2, window_bounds = array<i64: 1, 4, 32, 8>}, {transform_indices = @transform_3, window_bounds = array<i64: 1, 4, 32, 8>}, {transform_indices = @transform_4, window_bounds = array<i64: 1, 4, 32, 8>}, {transform_indices = @transform_5, window_bounds = array<i64: 1, 4, 1, 8>}, {transform_indices = @transform_6, window_bounds = array<i64: 1, 4, 1, 8>}, {transform_indices = @transform_7, window_bounds = array<i64: 1, 4, 1, 8>}, {transform_indices = @transform_8, window_bounds = array<i64: 1, 4, 8, 32>}, {transform_indices = @transform_9, window_bounds = array<i64: 1, 1, 32>}, {transform_indices = @transform_10, window_bounds = array<i64: 1, 1, 32>}, {transform_indices = @transform_11, window_bounds = array<i64: 1, 1, 32>}, {transform_indices = @transform_12, window_bounds = array<i64: 1, 32, 64>}, {transform_indices = @transform_13, window_bounds = array<i64: 1, 1, 64>}, {transform_indices = @transform_14, window_bounds = array<i64: 1, 64, 32>}, {transform_indices = @transform_15, window_bounds = array<i64: 1, 1, 32>}, {transform_indices = @transform_16, window_bounds = array<i64: 1, 1, 32>}, {transform_indices = @transform_17, window_bounds = array<i64: 1, 1, 32>}, {pipeline_mode = #tpu.pipeline_mode<synchronous>, transform_indices = @transform_18, window_bounds = array<i64: 32, 128>}, {pipeline_mode = #tpu.pipeline_mode<synchronous>, transform_indices = @transform_19, window_bounds = array<i64: 1, 128>}, {pipeline_mode = #tpu.pipeline_mode<synchronous>, transform_indices = @transform_20, window_bounds = array<i64: 16, 128>}]} {
    %c0_i32 = arith.constant 0 : i32
    %0 = arith.cmpi eq, %arg0, %c0_i32 : i32
    %1 = arith.extui %0 : i1 to i32
    %c0_i32_0 = arith.constant 0 : i32
    %2 = arith.cmpi ne, %1, %c0_i32_0 : i32
    scf.if %2 {
      %c0_349 = arith.constant 0 : index
      %c0_350 = arith.constant 0 : index
      %454 = vector.load %arg1[%c0_349, %c0_350] : memref<16x32xf32, #tpu.memory_space<vmem>>, vector<16x32xf32>
      %c0_351 = arith.constant 0 : index
      %c0_352 = arith.constant 0 : index
      %455 = vector.load %arg22[%c0_351, %c0_352] : memref<16x32xf32, #tpu.memory_space<vmem>>, vector<16x32xf32>
      tpu.vector_store %arg22[%c0_351, %c0_352], %454 {strides = array<i32>} : memref<16x32xf32, #tpu.memory_space<vmem>>, vector<16x32xf32>,
    } else {
    }
    %c0 = arith.constant 0 : index
    %c0_1 = arith.constant 0 : index
    %3 = vector.load %arg22[%c0, %c0_1] : memref<16x32xf32, #tpu.memory_space<vmem>>, vector<16x32xf32>
    %c0_2 = arith.constant 0 : index
    %c0_3 = arith.constant 0 : index
    %4 = vector.load %arg2[%c0_2, %c0_3] : memref<8x8xf32, #tpu.memory_space<vmem>>, vector<8x8xf32>
    %5 = vector.extract_strided_slice %3 {offsets = [0, 0], sizes = [8, 32], strides = [1, 1]} : vector<16x32xf32> to vector<8x32xf32>
    %6 = arith.truncf %5 : vector<8x32xf32> to vector<8x32xbf16>
    %cst = arith.constant 0.000000e+00 : f32
    %7 = vector.broadcast %cst : f32 to vector<8x32xf32>
    %c0_4 = arith.constant 0 : index
    %c0_5 = arith.constant 0 : index
    %c0_6 = arith.constant 0 : index
    %c0_7 = arith.constant 0 : index
    %8 = vector.load %arg3[%c0_4, %c0_5, %c0_6, %c0_7] : memref<1x4x32x8xbf16, #tpu.memory_space<vmem>>, vector<1x1x32x8xbf16>
    %9 = vector.shape_cast %8 : vector<1x1x32x8xbf16> to vector<32x8xbf16>
    %cst_8 = arith.constant dense<0.000000e+00> : vector<8x8xf32>
    %10 = tpu.matmul %6, %9, %cst_8 {dimension_numbers = #tpu.dot_dimension_numbers<[1], [0], [0], [1], [0, 0, 1, 1], [], []>} : vector<8x32xbf16>, vector<32x8xbf16>, vector<8x8xf32> -> vector<8x8xf32>
    %c0_9 = arith.constant 0 : index
    %c0_10 = arith.constant 0 : index
    %c0_11 = arith.constant 0 : index
    %c0_12 = arith.constant 0 : index
    %11 = vector.load %arg6[%c0_9, %c0_10, %c0_11, %c0_12] : memref<1x4x1x8xf32, #tpu.memory_space<vmem>>, vector<1x1x1x8xf32>
    %12 = vector.shape_cast %11 : vector<1x1x1x8xf32> to vector<1x8xf32>
    %13 = vector.broadcast %12 : vector<1x8xf32> to vector<8x8xf32>
    %14 = arith.addf %10, %13 : vector<8x8xf32>
    %c0_13 = arith.constant 0 : index
    %c0_14 = arith.constant 0 : index
    %c0_15 = arith.constant 0 : index
    %c0_16 = arith.constant 0 : index
    %15 = vector.load %arg4[%c0_13, %c0_14, %c0_15, %c0_16] : memref<1x4x32x8xbf16, #tpu.memory_space<vmem>>, vector<1x1x32x8xbf16>
    %16 = vector.shape_cast %15 : vector<1x1x32x8xbf16> to vector<32x8xbf16>
    %cst_17 = arith.constant dense<0.000000e+00> : vector<8x8xf32>
    %17 = tpu.matmul %6, %16, %cst_17 {dimension_numbers = #tpu.dot_dimension_numbers<[1], [0], [0], [1], [0, 0, 1, 1], [], []>} : vector<8x32xbf16>, vector<32x8xbf16>, vector<8x8xf32> -> vector<8x8xf32>
    %c0_18 = arith.constant 0 : index
    %c0_19 = arith.constant 0 : index
    %c0_20 = arith.constant 0 : index
    %c0_21 = arith.constant 0 : index
    %18 = vector.load %arg7[%c0_18, %c0_19, %c0_20, %c0_21] : memref<1x4x1x8xf32, #tpu.memory_space<vmem>>, vector<1x1x1x8xf32>
    %19 = vector.shape_cast %18 : vector<1x1x1x8xf32> to vector<1x8xf32>
    %20 = vector.broadcast %19 : vector<1x8xf32> to vector<8x8xf32>
    %21 = arith.addf %17, %20 : vector<8x8xf32>
    %c0_22 = arith.constant 0 : index
    %c0_23 = arith.constant 0 : index
    %c0_24 = arith.constant 0 : index
    %c0_25 = arith.constant 0 : index
    %22 = vector.load %arg5[%c0_22, %c0_23, %c0_24, %c0_25] : memref<1x4x32x8xbf16, #tpu.memory_space<vmem>>, vector<1x1x32x8xbf16>
    %23 = vector.shape_cast %22 : vector<1x1x32x8xbf16> to vector<32x8xbf16>
    %cst_26 = arith.constant dense<0.000000e+00> : vector<8x8xf32>
    %24 = tpu.matmul %6, %23, %cst_26 {dimension_numbers = #tpu.dot_dimension_numbers<[1], [0], [0], [1], [0, 0, 1, 1], [], []>} : vector<8x32xbf16>, vector<32x8xbf16>, vector<8x8xf32> -> vector<8x8xf32>
    %c0_27 = arith.constant 0 : index
    %c0_28 = arith.constant 0 : index
    %c0_29 = arith.constant 0 : index
    %c0_30 = arith.constant 0 : index
    %25 = vector.load %arg8[%c0_27, %c0_28, %c0_29, %c0_30] : memref<1x4x1x8xf32, #tpu.memory_space<vmem>>, vector<1x1x1x8xf32>
    %26 = vector.shape_cast %25 : vector<1x1x1x8xf32> to vector<1x8xf32>
    %27 = vector.broadcast %26 : vector<1x8xf32> to vector<8x8xf32>
    %28 = arith.addf %24, %27 : vector<8x8xf32>
    %29 = arith.truncf %14 : vector<8x8xf32> to vector<8x8xbf16>
    %30 = arith.truncf %21 : vector<8x8xf32> to vector<8x8xbf16>
    %cst_31 = arith.constant dense<0.000000e+00> : vector<8x8xf32>
    %31 = tpu.matmul %29, %30, %cst_31 {dimension_numbers = #tpu.dot_dimension_numbers<[1], [1], [0], [0], [0, 0, 1, 0], [], []>} : vector<8x8xbf16>, vector<8x8xbf16>, vector<8x8xf32> -> vector<8x8xf32>
    %cst_32 = arith.constant 0.353553385 : f32
    %32 = vector.broadcast %cst_32 : f32 to vector<8x8xf32>
    %33 = arith.mulf %31, %32 : vector<8x8xf32>
    %34 = arith.addf %33, %4 : vector<8x8xf32>
    %cst_33 = arith.constant dense<0xFF800000> : vector<8xf32>
    %35 = vector.multi_reduction <maximumf>, %34, %cst_33 [1] : vector<8x8xf32> to vector<8xf32>
    %36 = vector.shape_cast %35 : vector<8xf32> to vector<8x1xf32>
    %37 = vector.broadcast %36 : vector<8x1xf32> to vector<8x8xf32>
    %38 = arith.subf %34, %37 : vector<8x8xf32>
    %39 = math.exp %38 : vector<8x8xf32>
    %cst_34 = arith.constant dense<0.000000e+00> : vector<8xf32>
    %40 = vector.multi_reduction <add>, %39, %cst_34 [1] : vector<8x8xf32> to vector<8xf32>
    %41 = vector.shape_cast %40 : vector<8xf32> to vector<8x1xf32>
    %42 = tpu.reciprocal %41 {approx = true} : vector<8x1xf32> -> vector<8x1xf32>
    %43 = vector.broadcast %42 : vector<8x1xf32> to vector<8x8xf32>
    %44 = arith.mulf %39, %43 : vector<8x8xf32>
    %45 = arith.truncf %44 : vector<8x8xf32> to vector<8x8xbf16>
    %46 = arith.truncf %28 : vector<8x8xf32> to vector<8x8xbf16>
    %cst_35 = arith.constant dense<0.000000e+00> : vector<8x8xf32>
    %47 = tpu.matmul %45, %46, %cst_35 {dimension_numbers = #tpu.dot_dimension_numbers<[1], [0], [0], [1], [0, 0, 1, 1], [], []>} : vector<8x8xbf16>, vector<8x8xbf16>, vector<8x8xf32> -> vector<8x8xf32>
    %48 = arith.truncf %47 : vector<8x8xf32> to vector<8x8xbf16>
    %c0_36 = arith.constant 0 : index
    %c0_37 = arith.constant 0 : index
    %c0_38 = arith.constant 0 : index
    %c0_39 = arith.constant 0 : index
    %49 = vector.load %arg9[%c0_36, %c0_37, %c0_38, %c0_39] : memref<1x4x8x32xbf16, #tpu.memory_space<vmem>>, vector<1x1x8x32xbf16>
    %50 = vector.shape_cast %49 : vector<1x1x8x32xbf16> to vector<8x32xbf16>
    %cst_40 = arith.constant dense<0.000000e+00> : vector<8x32xf32>
    %51 = tpu.matmul %48, %50, %cst_40 {dimension_numbers = #tpu.dot_dimension_numbers<[1], [0], [0], [1], [0, 0, 1, 1], [], []>} : vector<8x8xbf16>, vector<8x32xbf16>, vector<8x32xf32> -> vector<8x32xf32>
    %52 = arith.addf %7, %51 : vector<8x32xf32>
    %c0_41 = arith.constant 0 : index
    %c1 = arith.constant 1 : index
    %c0_42 = arith.constant 0 : index
    %c0_43 = arith.constant 0 : index
    %53 = vector.load %arg3[%c0_41, %c1, %c0_42, %c0_43] : memref<1x4x32x8xbf16, #tpu.memory_space<vmem>>, vector<1x1x32x8xbf16>
    %54 = vector.shape_cast %53 : vector<1x1x32x8xbf16> to vector<32x8xbf16>
    %cst_44 = arith.constant dense<0.000000e+00> : vector<8x8xf32>
    %55 = tpu.matmul %6, %54, %cst_44 {dimension_numbers = #tpu.dot_dimension_numbers<[1], [0], [0], [1], [0, 0, 1, 1], [], []>} : vector<8x32xbf16>, vector<32x8xbf16>, vector<8x8xf32> -> vector<8x8xf32>
    %c0_45 = arith.constant 0 : index
    %c1_46 = arith.constant 1 : index
    %c0_47 = arith.constant 0 : index
    %c0_48 = arith.constant 0 : index
    %56 = vector.load %arg6[%c0_45, %c1_46, %c0_47, %c0_48] : memref<1x4x1x8xf32, #tpu.memory_space<vmem>>, vector<1x1x1x8xf32>
    %57 = vector.shape_cast %56 : vector<1x1x1x8xf32> to vector<1x8xf32>
    %58 = vector.broadcast %57 : vector<1x8xf32> to vector<8x8xf32>
    %59 = arith.addf %55, %58 : vector<8x8xf32>
    %c0_49 = arith.constant 0 : index
    %c1_50 = arith.constant 1 : index
    %c0_51 = arith.constant 0 : index
    %c0_52 = arith.constant 0 : index
    %60 = vector.load %arg4[%c0_49, %c1_50, %c0_51, %c0_52] : memref<1x4x32x8xbf16, #tpu.memory_space<vmem>>, vector<1x1x32x8xbf16>
    %61 = vector.shape_cast %60 : vector<1x1x32x8xbf16> to vector<32x8xbf16>
    %cst_53 = arith.constant dense<0.000000e+00> : vector<8x8xf32>
    %62 = tpu.matmul %6, %61, %cst_53 {dimension_numbers = #tpu.dot_dimension_numbers<[1], [0], [0], [1], [0, 0, 1, 1], [], []>} : vector<8x32xbf16>, vector<32x8xbf16>, vector<8x8xf32> -> vector<8x8xf32>
    %c0_54 = arith.constant 0 : index
    %c1_55 = arith.constant 1 : index
    %c0_56 = arith.constant 0 : index
    %c0_57 = arith.constant 0 : index
    %63 = vector.load %arg7[%c0_54, %c1_55, %c0_56, %c0_57] : memref<1x4x1x8xf32, #tpu.memory_space<vmem>>, vector<1x1x1x8xf32>
    %64 = vector.shape_cast %63 : vector<1x1x1x8xf32> to vector<1x8xf32>
    %65 = vector.broadcast %64 : vector<1x8xf32> to vector<8x8xf32>
    %66 = arith.addf %62, %65 : vector<8x8xf32>
    %c0_58 = arith.constant 0 : index
    %c1_59 = arith.constant 1 : index
    %c0_60 = arith.constant 0 : index
    %c0_61 = arith.constant 0 : index
    %67 = vector.load %arg5[%c0_58, %c1_59, %c0_60, %c0_61] : memref<1x4x32x8xbf16, #tpu.memory_space<vmem>>, vector<1x1x32x8xbf16>
    %68 = vector.shape_cast %67 : vector<1x1x32x8xbf16> to vector<32x8xbf16>
    %cst_62 = arith.constant dense<0.000000e+00> : vector<8x8xf32>
    %69 = tpu.matmul %6, %68, %cst_62 {dimension_numbers = #tpu.dot_dimension_numbers<[1], [0], [0], [1], [0, 0, 1, 1], [], []>} : vector<8x32xbf16>, vector<32x8xbf16>, vector<8x8xf32> -> vector<8x8xf32>
    %c0_63 = arith.constant 0 : index
    %c1_64 = arith.constant 1 : index
    %c0_65 = arith.constant 0 : index
    %c0_66 = arith.constant 0 : index
    %70 = vector.load %arg8[%c0_63, %c1_64, %c0_65, %c0_66] : memref<1x4x1x8xf32, #tpu.memory_space<vmem>>, vector<1x1x1x8xf32>
    %71 = vector.shape_cast %70 : vector<1x1x1x8xf32> to vector<1x8xf32>
    %72 = vector.broadcast %71 : vector<1x8xf32> to vector<8x8xf32>
    %73 = arith.addf %69, %72 : vector<8x8xf32>
    %74 = arith.truncf %59 : vector<8x8xf32> to vector<8x8xbf16>
    %75 = arith.truncf %66 : vector<8x8xf32> to vector<8x8xbf16>
    %cst_67 = arith.constant dense<0.000000e+00> : vector<8x8xf32>
    %76 = tpu.matmul %74, %75, %cst_67 {dimension_numbers = #tpu.dot_dimension_numbers<[1], [1], [0], [0], [0, 0, 1, 0], [], []>} : vector<8x8xbf16>, vector<8x8xbf16>, vector<8x8xf32> -> vector<8x8xf32>
    %cst_68 = arith.constant 0.353553385 : f32
    %77 = vector.broadcast %cst_68 : f32 to vector<8x8xf32>
    %78 = arith.mulf %76, %77 : vector<8x8xf32>
    %79 = arith.addf %78, %4 : vector<8x8xf32>
    %cst_69 = arith.constant dense<0xFF800000> : vector<8xf32>
    %80 = vector.multi_reduction <maximumf>, %79, %cst_69 [1] : vector<8x8xf32> to vector<8xf32>
    %81 = vector.shape_cast %80 : vector<8xf32> to vector<8x1xf32>
    %82 = vector.broadcast %81 : vector<8x1xf32> to vector<8x8xf32>
    %83 = arith.subf %79, %82 : vector<8x8xf32>
    %84 = math.exp %83 : vector<8x8xf32>
    %cst_70 = arith.constant dense<0.000000e+00> : vector<8xf32>
    %85 = vector.multi_reduction <add>, %84, %cst_70 [1] : vector<8x8xf32> to vector<8xf32>
    %86 = vector.shape_cast %85 : vector<8xf32> to vector<8x1xf32>
    %87 = tpu.reciprocal %86 {approx = true} : vector<8x1xf32> -> vector<8x1xf32>
    %88 = vector.broadcast %87 : vector<8x1xf32> to vector<8x8xf32>
    %89 = arith.mulf %84, %88 : vector<8x8xf32>
    %90 = arith.truncf %89 : vector<8x8xf32> to vector<8x8xbf16>
    %91 = arith.truncf %73 : vector<8x8xf32> to vector<8x8xbf16>
    %cst_71 = arith.constant dense<0.000000e+00> : vector<8x8xf32>
    %92 = tpu.matmul %90, %91, %cst_71 {dimension_numbers = #tpu.dot_dimension_numbers<[1], [0], [0], [1], [0, 0, 1, 1], [], []>} : vector<8x8xbf16>, vector<8x8xbf16>, vector<8x8xf32> -> vector<8x8xf32>
    %93 = arith.truncf %92 : vector<8x8xf32> to vector<8x8xbf16>
    %c0_72 = arith.constant 0 : index
    %c1_73 = arith.constant 1 : index
    %c0_74 = arith.constant 0 : index
    %c0_75 = arith.constant 0 : index
    %94 = vector.load %arg9[%c0_72, %c1_73, %c0_74, %c0_75] : memref<1x4x8x32xbf16, #tpu.memory_space<vmem>>, vector<1x1x8x32xbf16>
    %95 = vector.shape_cast %94 : vector<1x1x8x32xbf16> to vector<8x32xbf16>
    %cst_76 = arith.constant dense<0.000000e+00> : vector<8x32xf32>
    %96 = tpu.matmul %93, %95, %cst_76 {dimension_numbers = #tpu.dot_dimension_numbers<[1], [0], [0], [1], [0, 0, 1, 1], [], []>} : vector<8x8xbf16>, vector<8x32xbf16>, vector<8x32xf32> -> vector<8x32xf32>
    %97 = arith.addf %52, %96 : vector<8x32xf32>
    %c0_77 = arith.constant 0 : index
    %c2 = arith.constant 2 : index
    %c0_78 = arith.constant 0 : index
    %c0_79 = arith.constant 0 : index
    %98 = vector.load %arg3[%c0_77, %c2, %c0_78, %c0_79] : memref<1x4x32x8xbf16, #tpu.memory_space<vmem>>, vector<1x1x32x8xbf16>
    %99 = vector.shape_cast %98 : vector<1x1x32x8xbf16> to vector<32x8xbf16>
    %cst_80 = arith.constant dense<0.000000e+00> : vector<8x8xf32>
    %100 = tpu.matmul %6, %99, %cst_80 {dimension_numbers = #tpu.dot_dimension_numbers<[1], [0], [0], [1], [0, 0, 1, 1], [], []>} : vector<8x32xbf16>, vector<32x8xbf16>, vector<8x8xf32> -> vector<8x8xf32>
    %c0_81 = arith.constant 0 : index
    %c2_82 = arith.constant 2 : index
    %c0_83 = arith.constant 0 : index
    %c0_84 = arith.constant 0 : index
    %101 = vector.load %arg6[%c0_81, %c2_82, %c0_83, %c0_84] : memref<1x4x1x8xf32, #tpu.memory_space<vmem>>, vector<1x1x1x8xf32>
    %102 = vector.shape_cast %101 : vector<1x1x1x8xf32> to vector<1x8xf32>
    %103 = vector.broadcast %102 : vector<1x8xf32> to vector<8x8xf32>
    %104 = arith.addf %100, %103 : vector<8x8xf32>
    %c0_85 = arith.constant 0 : index
    %c2_86 = arith.constant 2 : index
    %c0_87 = arith.constant 0 : index
    %c0_88 = arith.constant 0 : index
    %105 = vector.load %arg4[%c0_85, %c2_86, %c0_87, %c0_88] : memref<1x4x32x8xbf16, #tpu.memory_space<vmem>>, vector<1x1x32x8xbf16>
    %106 = vector.shape_cast %105 : vector<1x1x32x8xbf16> to vector<32x8xbf16>
    %cst_89 = arith.constant dense<0.000000e+00> : vector<8x8xf32>
    %107 = tpu.matmul %6, %106, %cst_89 {dimension_numbers = #tpu.dot_dimension_numbers<[1], [0], [0], [1], [0, 0, 1, 1], [], []>} : vector<8x32xbf16>, vector<32x8xbf16>, vector<8x8xf32> -> vector<8x8xf32>
    %c0_90 = arith.constant 0 : index
    %c2_91 = arith.constant 2 : index
    %c0_92 = arith.constant 0 : index
    %c0_93 = arith.constant 0 : index
    %108 = vector.load %arg7[%c0_90, %c2_91, %c0_92, %c0_93] : memref<1x4x1x8xf32, #tpu.memory_space<vmem>>, vector<1x1x1x8xf32>
    %109 = vector.shape_cast %108 : vector<1x1x1x8xf32> to vector<1x8xf32>
    %110 = vector.broadcast %109 : vector<1x8xf32> to vector<8x8xf32>
    %111 = arith.addf %107, %110 : vector<8x8xf32>
    %c0_94 = arith.constant 0 : index
    %c2_95 = arith.constant 2 : index
    %c0_96 = arith.constant 0 : index
    %c0_97 = arith.constant 0 : index
    %112 = vector.load %arg5[%c0_94, %c2_95, %c0_96, %c0_97] : memref<1x4x32x8xbf16, #tpu.memory_space<vmem>>, vector<1x1x32x8xbf16>
    %113 = vector.shape_cast %112 : vector<1x1x32x8xbf16> to vector<32x8xbf16>
    %cst_98 = arith.constant dense<0.000000e+00> : vector<8x8xf32>
    %114 = tpu.matmul %6, %113, %cst_98 {dimension_numbers = #tpu.dot_dimension_numbers<[1], [0], [0], [1], [0, 0, 1, 1], [], []>} : vector<8x32xbf16>, vector<32x8xbf16>, vector<8x8xf32> -> vector<8x8xf32>
    %c0_99 = arith.constant 0 : index
    %c2_100 = arith.constant 2 : index
    %c0_101 = arith.constant 0 : index
    %c0_102 = arith.constant 0 : index
    %115 = vector.load %arg8[%c0_99, %c2_100, %c0_101, %c0_102] : memref<1x4x1x8xf32, #tpu.memory_space<vmem>>, vector<1x1x1x8xf32>
    %116 = vector.shape_cast %115 : vector<1x1x1x8xf32> to vector<1x8xf32>
    %117 = vector.broadcast %116 : vector<1x8xf32> to vector<8x8xf32>
    %118 = arith.addf %114, %117 : vector<8x8xf32>
    %119 = arith.truncf %104 : vector<8x8xf32> to vector<8x8xbf16>
    %120 = arith.truncf %111 : vector<8x8xf32> to vector<8x8xbf16>
    %cst_103 = arith.constant dense<0.000000e+00> : vector<8x8xf32>
    %121 = tpu.matmul %119, %120, %cst_103 {dimension_numbers = #tpu.dot_dimension_numbers<[1], [1], [0], [0], [0, 0, 1, 0], [], []>} : vector<8x8xbf16>, vector<8x8xbf16>, vector<8x8xf32> -> vector<8x8xf32>
    %cst_104 = arith.constant 0.353553385 : f32
    %122 = vector.broadcast %cst_104 : f32 to vector<8x8xf32>
    %123 = arith.mulf %121, %122 : vector<8x8xf32>
    %124 = arith.addf %123, %4 : vector<8x8xf32>
    %cst_105 = arith.constant dense<0xFF800000> : vector<8xf32>
    %125 = vector.multi_reduction <maximumf>, %124, %cst_105 [1] : vector<8x8xf32> to vector<8xf32>
    %126 = vector.shape_cast %125 : vector<8xf32> to vector<8x1xf32>
    %127 = vector.broadcast %126 : vector<8x1xf32> to vector<8x8xf32>
    %128 = arith.subf %124, %127 : vector<8x8xf32>
    %129 = math.exp %128 : vector<8x8xf32>
    %cst_106 = arith.constant dense<0.000000e+00> : vector<8xf32>
    %130 = vector.multi_reduction <add>, %129, %cst_106 [1] : vector<8x8xf32> to vector<8xf32>
    %131 = vector.shape_cast %130 : vector<8xf32> to vector<8x1xf32>
    %132 = tpu.reciprocal %131 {approx = true} : vector<8x1xf32> -> vector<8x1xf32>
    %133 = vector.broadcast %132 : vector<8x1xf32> to vector<8x8xf32>
    %134 = arith.mulf %129, %133 : vector<8x8xf32>
    %135 = arith.truncf %134 : vector<8x8xf32> to vector<8x8xbf16>
    %136 = arith.truncf %118 : vector<8x8xf32> to vector<8x8xbf16>
    %cst_107 = arith.constant dense<0.000000e+00> : vector<8x8xf32>
    %137 = tpu.matmul %135, %136, %cst_107 {dimension_numbers = #tpu.dot_dimension_numbers<[1], [0], [0], [1], [0, 0, 1, 1], [], []>} : vector<8x8xbf16>, vector<8x8xbf16>, vector<8x8xf32> -> vector<8x8xf32>
    %138 = arith.truncf %137 : vector<8x8xf32> to vector<8x8xbf16>
    %c0_108 = arith.constant 0 : index
    %c2_109 = arith.constant 2 : index
    %c0_110 = arith.constant 0 : index
    %c0_111 = arith.constant 0 : index
    %139 = vector.load %arg9[%c0_108, %c2_109, %c0_110, %c0_111] : memref<1x4x8x32xbf16, #tpu.memory_space<vmem>>, vector<1x1x8x32xbf16>
    %140 = vector.shape_cast %139 : vector<1x1x8x32xbf16> to vector<8x32xbf16>
    %cst_112 = arith.constant dense<0.000000e+00> : vector<8x32xf32>
    %141 = tpu.matmul %138, %140, %cst_112 {dimension_numbers = #tpu.dot_dimension_numbers<[1], [0], [0], [1], [0, 0, 1, 1], [], []>} : vector<8x8xbf16>, vector<8x32xbf16>, vector<8x32xf32> -> vector<8x32xf32>
    %142 = arith.addf %97, %141 : vector<8x32xf32>
    %c0_113 = arith.constant 0 : index
    %c3 = arith.constant 3 : index
    %c0_114 = arith.constant 0 : index
    %c0_115 = arith.constant 0 : index
    %143 = vector.load %arg3[%c0_113, %c3, %c0_114, %c0_115] : memref<1x4x32x8xbf16, #tpu.memory_space<vmem>>, vector<1x1x32x8xbf16>
    %144 = vector.shape_cast %143 : vector<1x1x32x8xbf16> to vector<32x8xbf16>
    %cst_116 = arith.constant dense<0.000000e+00> : vector<8x8xf32>
    %145 = tpu.matmul %6, %144, %cst_116 {dimension_numbers = #tpu.dot_dimension_numbers<[1], [0], [0], [1], [0, 0, 1, 1], [], []>} : vector<8x32xbf16>, vector<32x8xbf16>, vector<8x8xf32> -> vector<8x8xf32>
    %c0_117 = arith.constant 0 : index
    %c3_118 = arith.constant 3 : index
    %c0_119 = arith.constant 0 : index
    %c0_120 = arith.constant 0 : index
    %146 = vector.load %arg6[%c0_117, %c3_118, %c0_119, %c0_120] : memref<1x4x1x8xf32, #tpu.memory_space<vmem>>, vector<1x1x1x8xf32>
    %147 = vector.shape_cast %146 : vector<1x1x1x8xf32> to vector<1x8xf32>
    %148 = vector.broadcast %147 : vector<1x8xf32> to vector<8x8xf32>
    %149 = arith.addf %145, %148 : vector<8x8xf32>
    %c0_121 = arith.constant 0 : index
    %c3_122 = arith.constant 3 : index
    %c0_123 = arith.constant 0 : index
    %c0_124 = arith.constant 0 : index
    %150 = vector.load %arg4[%c0_121, %c3_122, %c0_123, %c0_124] : memref<1x4x32x8xbf16, #tpu.memory_space<vmem>>, vector<1x1x32x8xbf16>
    %151 = vector.shape_cast %150 : vector<1x1x32x8xbf16> to vector<32x8xbf16>
    %cst_125 = arith.constant dense<0.000000e+00> : vector<8x8xf32>
    %152 = tpu.matmul %6, %151, %cst_125 {dimension_numbers = #tpu.dot_dimension_numbers<[1], [0], [0], [1], [0, 0, 1, 1], [], []>} : vector<8x32xbf16>, vector<32x8xbf16>, vector<8x8xf32> -> vector<8x8xf32>
    %c0_126 = arith.constant 0 : index
    %c3_127 = arith.constant 3 : index
    %c0_128 = arith.constant 0 : index
    %c0_129 = arith.constant 0 : index
    %153 = vector.load %arg7[%c0_126, %c3_127, %c0_128, %c0_129] : memref<1x4x1x8xf32, #tpu.memory_space<vmem>>, vector<1x1x1x8xf32>
    %154 = vector.shape_cast %153 : vector<1x1x1x8xf32> to vector<1x8xf32>
    %155 = vector.broadcast %154 : vector<1x8xf32> to vector<8x8xf32>
    %156 = arith.addf %152, %155 : vector<8x8xf32>
    %c0_130 = arith.constant 0 : index
    %c3_131 = arith.constant 3 : index
    %c0_132 = arith.constant 0 : index
    %c0_133 = arith.constant 0 : index
    %157 = vector.load %arg5[%c0_130, %c3_131, %c0_132, %c0_133] : memref<1x4x32x8xbf16, #tpu.memory_space<vmem>>, vector<1x1x32x8xbf16>
    %158 = vector.shape_cast %157 : vector<1x1x32x8xbf16> to vector<32x8xbf16>
    %cst_134 = arith.constant dense<0.000000e+00> : vector<8x8xf32>
    %159 = tpu.matmul %6, %158, %cst_134 {dimension_numbers = #tpu.dot_dimension_numbers<[1], [0], [0], [1], [0, 0, 1, 1], [], []>} : vector<8x32xbf16>, vector<32x8xbf16>, vector<8x8xf32> -> vector<8x8xf32>
    %c0_135 = arith.constant 0 : index
    %c3_136 = arith.constant 3 : index
    %c0_137 = arith.constant 0 : index
    %c0_138 = arith.constant 0 : index
    %160 = vector.load %arg8[%c0_135, %c3_136, %c0_137, %c0_138] : memref<1x4x1x8xf32, #tpu.memory_space<vmem>>, vector<1x1x1x8xf32>
    %161 = vector.shape_cast %160 : vector<1x1x1x8xf32> to vector<1x8xf32>
    %162 = vector.broadcast %161 : vector<1x8xf32> to vector<8x8xf32>
    %163 = arith.addf %159, %162 : vector<8x8xf32>
    %164 = arith.truncf %149 : vector<8x8xf32> to vector<8x8xbf16>
    %165 = arith.truncf %156 : vector<8x8xf32> to vector<8x8xbf16>
    %cst_139 = arith.constant dense<0.000000e+00> : vector<8x8xf32>
    %166 = tpu.matmul %164, %165, %cst_139 {dimension_numbers = #tpu.dot_dimension_numbers<[1], [1], [0], [0], [0, 0, 1, 0], [], []>} : vector<8x8xbf16>, vector<8x8xbf16>, vector<8x8xf32> -> vector<8x8xf32>
    %cst_140 = arith.constant 0.353553385 : f32
    %167 = vector.broadcast %cst_140 : f32 to vector<8x8xf32>
    %168 = arith.mulf %166, %167 : vector<8x8xf32>
    %169 = arith.addf %168, %4 : vector<8x8xf32>
    %cst_141 = arith.constant dense<0xFF800000> : vector<8xf32>
    %170 = vector.multi_reduction <maximumf>, %169, %cst_141 [1] : vector<8x8xf32> to vector<8xf32>
    %171 = vector.shape_cast %170 : vector<8xf32> to vector<8x1xf32>
    %172 = vector.broadcast %171 : vector<8x1xf32> to vector<8x8xf32>
    %173 = arith.subf %169, %172 : vector<8x8xf32>
    %174 = math.exp %173 : vector<8x8xf32>
    %cst_142 = arith.constant dense<0.000000e+00> : vector<8xf32>
    %175 = vector.multi_reduction <add>, %174, %cst_142 [1] : vector<8x8xf32> to vector<8xf32>
    %176 = vector.shape_cast %175 : vector<8xf32> to vector<8x1xf32>
    %177 = tpu.reciprocal %176 {approx = true} : vector<8x1xf32> -> vector<8x1xf32>
    %178 = vector.broadcast %177 : vector<8x1xf32> to vector<8x8xf32>
    %179 = arith.mulf %174, %178 : vector<8x8xf32>
    %180 = arith.truncf %179 : vector<8x8xf32> to vector<8x8xbf16>
    %181 = arith.truncf %163 : vector<8x8xf32> to vector<8x8xbf16>
    %cst_143 = arith.constant dense<0.000000e+00> : vector<8x8xf32>
    %182 = tpu.matmul %180, %181, %cst_143 {dimension_numbers = #tpu.dot_dimension_numbers<[1], [0], [0], [1], [0, 0, 1, 1], [], []>} : vector<8x8xbf16>, vector<8x8xbf16>, vector<8x8xf32> -> vector<8x8xf32>
    %183 = arith.truncf %182 : vector<8x8xf32> to vector<8x8xbf16>
    %c0_144 = arith.constant 0 : index
    %c3_145 = arith.constant 3 : index
    %c0_146 = arith.constant 0 : index
    %c0_147 = arith.constant 0 : index
    %184 = vector.load %arg9[%c0_144, %c3_145, %c0_146, %c0_147] : memref<1x4x8x32xbf16, #tpu.memory_space<vmem>>, vector<1x1x8x32xbf16>
    %185 = vector.shape_cast %184 : vector<1x1x8x32xbf16> to vector<8x32xbf16>
    %cst_148 = arith.constant dense<0.000000e+00> : vector<8x32xf32>
    %186 = tpu.matmul %183, %185, %cst_148 {dimension_numbers = #tpu.dot_dimension_numbers<[1], [0], [0], [1], [0, 0, 1, 1], [], []>} : vector<8x8xbf16>, vector<8x32xbf16>, vector<8x32xf32> -> vector<8x32xf32>
    %187 = arith.addf %142, %186 : vector<8x32xf32>
    %c0_149 = arith.constant 0 : index
    %c0_150 = arith.constant 0 : index
    %c0_151 = arith.constant 0 : index
    %188 = vector.load %arg10[%c0_149, %c0_150, %c0_151] : memref<1x1x32xf32, #tpu.memory_space<vmem>>, vector<1x1x32xf32>
    %189 = vector.shape_cast %188 : vector<1x1x32xf32> to vector<1x32xf32>
    %190 = vector.broadcast %189 : vector<1x32xf32> to vector<8x32xf32>
    %191 = arith.addf %187, %190 : vector<8x32xf32>
    %c0_152 = arith.constant 0 : index
    %c0_153 = arith.constant 0 : index
    %192 = vector.load %arg23[%c0_152, %c0_153] : memref<16x32xf32, #tpu.memory_space<vmem>>, vector<8x32xf32>
    tpu.vector_store %arg23[%c0_152, %c0_153], %191 {strides = array<i32>} : memref<16x32xf32, #tpu.memory_space<vmem>>, vector<8x32xf32>,
    %193 = vector.extract_strided_slice %3 {offsets = [8, 0], sizes = [8, 32], strides = [1, 1]} : vector<16x32xf32> to vector<8x32xf32>
    %194 = arith.truncf %193 : vector<8x32xf32> to vector<8x32xbf16>
    %cst_154 = arith.constant 0.000000e+00 : f32
    %195 = vector.broadcast %cst_154 : f32 to vector<8x32xf32>
    %c0_155 = arith.constant 0 : index
    %c0_156 = arith.constant 0 : index
    %c0_157 = arith.constant 0 : index
    %c0_158 = arith.constant 0 : index
    %196 = vector.load %arg3[%c0_155, %c0_156, %c0_157, %c0_158] : memref<1x4x32x8xbf16, #tpu.memory_space<vmem>>, vector<1x1x32x8xbf16>
    %197 = vector.shape_cast %196 : vector<1x1x32x8xbf16> to vector<32x8xbf16>
    %cst_159 = arith.constant dense<0.000000e+00> : vector<8x8xf32>
    %198 = tpu.matmul %194, %197, %cst_159 {dimension_numbers = #tpu.dot_dimension_numbers<[1], [0], [0], [1], [0, 0, 1, 1], [], []>} : vector<8x32xbf16>, vector<32x8xbf16>, vector<8x8xf32> -> vector<8x8xf32>
    %c0_160 = arith.constant 0 : index
    %c0_161 = arith.constant 0 : index
    %c0_162 = arith.constant 0 : index
    %c0_163 = arith.constant 0 : index
    %199 = vector.load %arg6[%c0_160, %c0_161, %c0_162, %c0_163] : memref<1x4x1x8xf32, #tpu.memory_space<vmem>>, vector<1x1x1x8xf32>
    %200 = vector.shape_cast %199 : vector<1x1x1x8xf32> to vector<1x8xf32>
    %201 = vector.broadcast %200 : vector<1x8xf32> to vector<8x8xf32>
    %202 = arith.addf %198, %201 : vector<8x8xf32>
    %c0_164 = arith.constant 0 : index
    %c0_165 = arith.constant 0 : index
    %c0_166 = arith.constant 0 : index
    %c0_167 = arith.constant 0 : index
    %203 = vector.load %arg4[%c0_164, %c0_165, %c0_166, %c0_167] : memref<1x4x32x8xbf16, #tpu.memory_space<vmem>>, vector<1x1x32x8xbf16>
    %204 = vector.shape_cast %203 : vector<1x1x32x8xbf16> to vector<32x8xbf16>
    %cst_168 = arith.constant dense<0.000000e+00> : vector<8x8xf32>
    %205 = tpu.matmul %194, %204, %cst_168 {dimension_numbers = #tpu.dot_dimension_numbers<[1], [0], [0], [1], [0, 0, 1, 1], [], []>} : vector<8x32xbf16>, vector<32x8xbf16>, vector<8x8xf32> -> vector<8x8xf32>
    %c0_169 = arith.constant 0 : index
    %c0_170 = arith.constant 0 : index
    %c0_171 = arith.constant 0 : index
    %c0_172 = arith.constant 0 : index
    %206 = vector.load %arg7[%c0_169, %c0_170, %c0_171, %c0_172] : memref<1x4x1x8xf32, #tpu.memory_space<vmem>>, vector<1x1x1x8xf32>
    %207 = vector.shape_cast %206 : vector<1x1x1x8xf32> to vector<1x8xf32>
    %208 = vector.broadcast %207 : vector<1x8xf32> to vector<8x8xf32>
    %209 = arith.addf %205, %208 : vector<8x8xf32>
    %c0_173 = arith.constant 0 : index
    %c0_174 = arith.constant 0 : index
    %c0_175 = arith.constant 0 : index
    %c0_176 = arith.constant 0 : index
    %210 = vector.load %arg5[%c0_173, %c0_174, %c0_175, %c0_176] : memref<1x4x32x8xbf16, #tpu.memory_space<vmem>>, vector<1x1x32x8xbf16>
    %211 = vector.shape_cast %210 : vector<1x1x32x8xbf16> to vector<32x8xbf16>
    %cst_177 = arith.constant dense<0.000000e+00> : vector<8x8xf32>
    %212 = tpu.matmul %194, %211, %cst_177 {dimension_numbers = #tpu.dot_dimension_numbers<[1], [0], [0], [1], [0, 0, 1, 1], [], []>} : vector<8x32xbf16>, vector<32x8xbf16>, vector<8x8xf32> -> vector<8x8xf32>
    %c0_178 = arith.constant 0 : index
    %c0_179 = arith.constant 0 : index
    %c0_180 = arith.constant 0 : index
    %c0_181 = arith.constant 0 : index
    %213 = vector.load %arg8[%c0_178, %c0_179, %c0_180, %c0_181] : memref<1x4x1x8xf32, #tpu.memory_space<vmem>>, vector<1x1x1x8xf32>
    %214 = vector.shape_cast %213 : vector<1x1x1x8xf32> to vector<1x8xf32>
    %215 = vector.broadcast %214 : vector<1x8xf32> to vector<8x8xf32>
    %216 = arith.addf %212, %215 : vector<8x8xf32>
    %217 = arith.truncf %202 : vector<8x8xf32> to vector<8x8xbf16>
    %218 = arith.truncf %209 : vector<8x8xf32> to vector<8x8xbf16>
    %cst_182 = arith.constant dense<0.000000e+00> : vector<8x8xf32>
    %219 = tpu.matmul %217, %218, %cst_182 {dimension_numbers = #tpu.dot_dimension_numbers<[1], [1], [0], [0], [0, 0, 1, 0], [], []>} : vector<8x8xbf16>, vector<8x8xbf16>, vector<8x8xf32> -> vector<8x8xf32>
    %cst_183 = arith.constant 0.353553385 : f32
    %220 = vector.broadcast %cst_183 : f32 to vector<8x8xf32>
    %221 = arith.mulf %219, %220 : vector<8x8xf32>
    %222 = arith.addf %221, %4 : vector<8x8xf32>
    %cst_184 = arith.constant dense<0xFF800000> : vector<8xf32>
    %223 = vector.multi_reduction <maximumf>, %222, %cst_184 [1] : vector<8x8xf32> to vector<8xf32>
    %224 = vector.shape_cast %223 : vector<8xf32> to vector<8x1xf32>
    %225 = vector.broadcast %224 : vector<8x1xf32> to vector<8x8xf32>
    %226 = arith.subf %222, %225 : vector<8x8xf32>
    %227 = math.exp %226 : vector<8x8xf32>
    %cst_185 = arith.constant dense<0.000000e+00> : vector<8xf32>
    %228 = vector.multi_reduction <add>, %227, %cst_185 [1] : vector<8x8xf32> to vector<8xf32>
    %229 = vector.shape_cast %228 : vector<8xf32> to vector<8x1xf32>
    %230 = tpu.reciprocal %229 {approx = true} : vector<8x1xf32> -> vector<8x1xf32>
    %231 = vector.broadcast %230 : vector<8x1xf32> to vector<8x8xf32>
    %232 = arith.mulf %227, %231 : vector<8x8xf32>
    %233 = arith.truncf %232 : vector<8x8xf32> to vector<8x8xbf16>
    %234 = arith.truncf %216 : vector<8x8xf32> to vector<8x8xbf16>
    %cst_186 = arith.constant dense<0.000000e+00> : vector<8x8xf32>
    %235 = tpu.matmul %233, %234, %cst_186 {dimension_numbers = #tpu.dot_dimension_numbers<[1], [0], [0], [1], [0, 0, 1, 1], [], []>} : vector<8x8xbf16>, vector<8x8xbf16>, vector<8x8xf32> -> vector<8x8xf32>
    %236 = arith.truncf %235 : vector<8x8xf32> to vector<8x8xbf16>
    %c0_187 = arith.constant 0 : index
    %c0_188 = arith.constant 0 : index
    %c0_189 = arith.constant 0 : index
    %c0_190 = arith.constant 0 : index
    %237 = vector.load %arg9[%c0_187, %c0_188, %c0_189, %c0_190] : memref<1x4x8x32xbf16, #tpu.memory_space<vmem>>, vector<1x1x8x32xbf16>
    %238 = vector.shape_cast %237 : vector<1x1x8x32xbf16> to vector<8x32xbf16>
    %cst_191 = arith.constant dense<0.000000e+00> : vector<8x32xf32>
    %239 = tpu.matmul %236, %238, %cst_191 {dimension_numbers = #tpu.dot_dimension_numbers<[1], [0], [0], [1], [0, 0, 1, 1], [], []>} : vector<8x8xbf16>, vector<8x32xbf16>, vector<8x32xf32> -> vector<8x32xf32>
    %240 = arith.addf %195, %239 : vector<8x32xf32>
    %c0_192 = arith.constant 0 : index
    %c1_193 = arith.constant 1 : index
    %c0_194 = arith.constant 0 : index
    %c0_195 = arith.constant 0 : index
    %241 = vector.load %arg3[%c0_192, %c1_193, %c0_194, %c0_195] : memref<1x4x32x8xbf16, #tpu.memory_space<vmem>>, vector<1x1x32x8xbf16>
    %242 = vector.shape_cast %241 : vector<1x1x32x8xbf16> to vector<32x8xbf16>
    %cst_196 = arith.constant dense<0.000000e+00> : vector<8x8xf32>
    %243 = tpu.matmul %194, %242, %cst_196 {dimension_numbers = #tpu.dot_dimension_numbers<[1], [0], [0], [1], [0, 0, 1, 1], [], []>} : vector<8x32xbf16>, vector<32x8xbf16>, vector<8x8xf32> -> vector<8x8xf32>
    %c0_197 = arith.constant 0 : index
    %c1_198 = arith.constant 1 : index
    %c0_199 = arith.constant 0 : index
    %c0_200 = arith.constant 0 : index
    %244 = vector.load %arg6[%c0_197, %c1_198, %c0_199, %c0_200] : memref<1x4x1x8xf32, #tpu.memory_space<vmem>>, vector<1x1x1x8xf32>
    %245 = vector.shape_cast %244 : vector<1x1x1x8xf32> to vector<1x8xf32>
    %246 = vector.broadcast %245 : vector<1x8xf32> to vector<8x8xf32>
    %247 = arith.addf %243, %246 : vector<8x8xf32>
    %c0_201 = arith.constant 0 : index
    %c1_202 = arith.constant 1 : index
    %c0_203 = arith.constant 0 : index
    %c0_204 = arith.constant 0 : index
    %248 = vector.load %arg4[%c0_201, %c1_202, %c0_203, %c0_204] : memref<1x4x32x8xbf16, #tpu.memory_space<vmem>>, vector<1x1x32x8xbf16>
    %249 = vector.shape_cast %248 : vector<1x1x32x8xbf16> to vector<32x8xbf16>
    %cst_205 = arith.constant dense<0.000000e+00> : vector<8x8xf32>
    %250 = tpu.matmul %194, %249, %cst_205 {dimension_numbers = #tpu.dot_dimension_numbers<[1], [0], [0], [1], [0, 0, 1, 1], [], []>} : vector<8x32xbf16>, vector<32x8xbf16>, vector<8x8xf32> -> vector<8x8xf32>
    %c0_206 = arith.constant 0 : index
    %c1_207 = arith.constant 1 : index
    %c0_208 = arith.constant 0 : index
    %c0_209 = arith.constant 0 : index
    %251 = vector.load %arg7[%c0_206, %c1_207, %c0_208, %c0_209] : memref<1x4x1x8xf32, #tpu.memory_space<vmem>>, vector<1x1x1x8xf32>
    %252 = vector.shape_cast %251 : vector<1x1x1x8xf32> to vector<1x8xf32>
    %253 = vector.broadcast %252 : vector<1x8xf32> to vector<8x8xf32>
    %254 = arith.addf %250, %253 : vector<8x8xf32>
    %c0_210 = arith.constant 0 : index
    %c1_211 = arith.constant 1 : index
    %c0_212 = arith.constant 0 : index
    %c0_213 = arith.constant 0 : index
    %255 = vector.load %arg5[%c0_210, %c1_211, %c0_212, %c0_213] : memref<1x4x32x8xbf16, #tpu.memory_space<vmem>>, vector<1x1x32x8xbf16>
    %256 = vector.shape_cast %255 : vector<1x1x32x8xbf16> to vector<32x8xbf16>
    %cst_214 = arith.constant dense<0.000000e+00> : vector<8x8xf32>
    %257 = tpu.matmul %194, %256, %cst_214 {dimension_numbers = #tpu.dot_dimension_numbers<[1], [0], [0], [1], [0, 0, 1, 1], [], []>} : vector<8x32xbf16>, vector<32x8xbf16>, vector<8x8xf32> -> vector<8x8xf32>
    %c0_215 = arith.constant 0 : index
    %c1_216 = arith.constant 1 : index
    %c0_217 = arith.constant 0 : index
    %c0_218 = arith.constant 0 : index
    %258 = vector.load %arg8[%c0_215, %c1_216, %c0_217, %c0_218] : memref<1x4x1x8xf32, #tpu.memory_space<vmem>>, vector<1x1x1x8xf32>
    %259 = vector.shape_cast %258 : vector<1x1x1x8xf32> to vector<1x8xf32>
    %260 = vector.broadcast %259 : vector<1x8xf32> to vector<8x8xf32>
    %261 = arith.addf %257, %260 : vector<8x8xf32>
    %262 = arith.truncf %247 : vector<8x8xf32> to vector<8x8xbf16>
    %263 = arith.truncf %254 : vector<8x8xf32> to vector<8x8xbf16>
    %cst_219 = arith.constant dense<0.000000e+00> : vector<8x8xf32>
    %264 = tpu.matmul %262, %263, %cst_219 {dimension_numbers = #tpu.dot_dimension_numbers<[1], [1], [0], [0], [0, 0, 1, 0], [], []>} : vector<8x8xbf16>, vector<8x8xbf16>, vector<8x8xf32> -> vector<8x8xf32>
    %cst_220 = arith.constant 0.353553385 : f32
    %265 = vector.broadcast %cst_220 : f32 to vector<8x8xf32>
    %266 = arith.mulf %264, %265 : vector<8x8xf32>
    %267 = arith.addf %266, %4 : vector<8x8xf32>
    %cst_221 = arith.constant dense<0xFF800000> : vector<8xf32>
    %268 = vector.multi_reduction <maximumf>, %267, %cst_221 [1] : vector<8x8xf32> to vector<8xf32>
    %269 = vector.shape_cast %268 : vector<8xf32> to vector<8x1xf32>
    %270 = vector.broadcast %269 : vector<8x1xf32> to vector<8x8xf32>
    %271 = arith.subf %267, %270 : vector<8x8xf32>
    %272 = math.exp %271 : vector<8x8xf32>
    %cst_222 = arith.constant dense<0.000000e+00> : vector<8xf32>
    %273 = vector.multi_reduction <add>, %272, %cst_222 [1] : vector<8x8xf32> to vector<8xf32>
    %274 = vector.shape_cast %273 : vector<8xf32> to vector<8x1xf32>
    %275 = tpu.reciprocal %274 {approx = true} : vector<8x1xf32> -> vector<8x1xf32>
    %276 = vector.broadcast %275 : vector<8x1xf32> to vector<8x8xf32>
    %277 = arith.mulf %272, %276 : vector<8x8xf32>
    %278 = arith.truncf %277 : vector<8x8xf32> to vector<8x8xbf16>
    %279 = arith.truncf %261 : vector<8x8xf32> to vector<8x8xbf16>
    %cst_223 = arith.constant dense<0.000000e+00> : vector<8x8xf32>
    %280 = tpu.matmul %278, %279, %cst_223 {dimension_numbers = #tpu.dot_dimension_numbers<[1], [0], [0], [1], [0, 0, 1, 1], [], []>} : vector<8x8xbf16>, vector<8x8xbf16>, vector<8x8xf32> -> vector<8x8xf32>
    %281 = arith.truncf %280 : vector<8x8xf32> to vector<8x8xbf16>
    %c0_224 = arith.constant 0 : index
    %c1_225 = arith.constant 1 : index
    %c0_226 = arith.constant 0 : index
    %c0_227 = arith.constant 0 : index
    %282 = vector.load %arg9[%c0_224, %c1_225, %c0_226, %c0_227] : memref<1x4x8x32xbf16, #tpu.memory_space<vmem>>, vector<1x1x8x32xbf16>
    %283 = vector.shape_cast %282 : vector<1x1x8x32xbf16> to vector<8x32xbf16>
    %cst_228 = arith.constant dense<0.000000e+00> : vector<8x32xf32>
    %284 = tpu.matmul %281, %283, %cst_228 {dimension_numbers = #tpu.dot_dimension_numbers<[1], [0], [0], [1], [0, 0, 1, 1], [], []>} : vector<8x8xbf16>, vector<8x32xbf16>, vector<8x32xf32> -> vector<8x32xf32>
    %285 = arith.addf %240, %284 : vector<8x32xf32>
    %c0_229 = arith.constant 0 : index
    %c2_230 = arith.constant 2 : index
    %c0_231 = arith.constant 0 : index
    %c0_232 = arith.constant 0 : index
    %286 = vector.load %arg3[%c0_229, %c2_230, %c0_231, %c0_232] : memref<1x4x32x8xbf16, #tpu.memory_space<vmem>>, vector<1x1x32x8xbf16>
    %287 = vector.shape_cast %286 : vector<1x1x32x8xbf16> to vector<32x8xbf16>
    %cst_233 = arith.constant dense<0.000000e+00> : vector<8x8xf32>
    %288 = tpu.matmul %194, %287, %cst_233 {dimension_numbers = #tpu.dot_dimension_numbers<[1], [0], [0], [1], [0, 0, 1, 1], [], []>} : vector<8x32xbf16>, vector<32x8xbf16>, vector<8x8xf32> -> vector<8x8xf32>
    %c0_234 = arith.constant 0 : index
    %c2_235 = arith.constant 2 : index
    %c0_236 = arith.constant 0 : index
    %c0_237 = arith.constant 0 : index
    %289 = vector.load %arg6[%c0_234, %c2_235, %c0_236, %c0_237] : memref<1x4x1x8xf32, #tpu.memory_space<vmem>>, vector<1x1x1x8xf32>
    %290 = vector.shape_cast %289 : vector<1x1x1x8xf32> to vector<1x8xf32>
    %291 = vector.broadcast %290 : vector<1x8xf32> to vector<8x8xf32>
    %292 = arith.addf %288, %291 : vector<8x8xf32>
    %c0_238 = arith.constant 0 : index
    %c2_239 = arith.constant 2 : index
    %c0_240 = arith.constant 0 : index
    %c0_241 = arith.constant 0 : index
    %293 = vector.load %arg4[%c0_238, %c2_239, %c0_240, %c0_241] : memref<1x4x32x8xbf16, #tpu.memory_space<vmem>>, vector<1x1x32x8xbf16>
    %294 = vector.shape_cast %293 : vector<1x1x32x8xbf16> to vector<32x8xbf16>
    %cst_242 = arith.constant dense<0.000000e+00> : vector<8x8xf32>
    %295 = tpu.matmul %194, %294, %cst_242 {dimension_numbers = #tpu.dot_dimension_numbers<[1], [0], [0], [1], [0, 0, 1, 1], [], []>} : vector<8x32xbf16>, vector<32x8xbf16>, vector<8x8xf32> -> vector<8x8xf32>
    %c0_243 = arith.constant 0 : index
    %c2_244 = arith.constant 2 : index
    %c0_245 = arith.constant 0 : index
    %c0_246 = arith.constant 0 : index
    %296 = vector.load %arg7[%c0_243, %c2_244, %c0_245, %c0_246] : memref<1x4x1x8xf32, #tpu.memory_space<vmem>>, vector<1x1x1x8xf32>
    %297 = vector.shape_cast %296 : vector<1x1x1x8xf32> to vector<1x8xf32>
    %298 = vector.broadcast %297 : vector<1x8xf32> to vector<8x8xf32>
    %299 = arith.addf %295, %298 : vector<8x8xf32>
    %c0_247 = arith.constant 0 : index
    %c2_248 = arith.constant 2 : index
    %c0_249 = arith.constant 0 : index
    %c0_250 = arith.constant 0 : index
    %300 = vector.load %arg5[%c0_247, %c2_248, %c0_249, %c0_250] : memref<1x4x32x8xbf16, #tpu.memory_space<vmem>>, vector<1x1x32x8xbf16>
    %301 = vector.shape_cast %300 : vector<1x1x32x8xbf16> to vector<32x8xbf16>
    %cst_251 = arith.constant dense<0.000000e+00> : vector<8x8xf32>
    %302 = tpu.matmul %194, %301, %cst_251 {dimension_numbers = #tpu.dot_dimension_numbers<[1], [0], [0], [1], [0, 0, 1, 1], [], []>} : vector<8x32xbf16>, vector<32x8xbf16>, vector<8x8xf32> -> vector<8x8xf32>
    %c0_252 = arith.constant 0 : index
    %c2_253 = arith.constant 2 : index
    %c0_254 = arith.constant 0 : index
    %c0_255 = arith.constant 0 : index
    %303 = vector.load %arg8[%c0_252, %c2_253, %c0_254, %c0_255] : memref<1x4x1x8xf32, #tpu.memory_space<vmem>>, vector<1x1x1x8xf32>
    %304 = vector.shape_cast %303 : vector<1x1x1x8xf32> to vector<1x8xf32>
    %305 = vector.broadcast %304 : vector<1x8xf32> to vector<8x8xf32>
    %306 = arith.addf %302, %305 : vector<8x8xf32>
    %307 = arith.truncf %292 : vector<8x8xf32> to vector<8x8xbf16>
    %308 = arith.truncf %299 : vector<8x8xf32> to vector<8x8xbf16>
    %cst_256 = arith.constant dense<0.000000e+00> : vector<8x8xf32>
    %309 = tpu.matmul %307, %308, %cst_256 {dimension_numbers = #tpu.dot_dimension_numbers<[1], [1], [0], [0], [0, 0, 1, 0], [], []>} : vector<8x8xbf16>, vector<8x8xbf16>, vector<8x8xf32> -> vector<8x8xf32>
    %cst_257 = arith.constant 0.353553385 : f32
    %310 = vector.broadcast %cst_257 : f32 to vector<8x8xf32>
    %311 = arith.mulf %309, %310 : vector<8x8xf32>
    %312 = arith.addf %311, %4 : vector<8x8xf32>
    %cst_258 = arith.constant dense<0xFF800000> : vector<8xf32>
    %313 = vector.multi_reduction <maximumf>, %312, %cst_258 [1] : vector<8x8xf32> to vector<8xf32>
    %314 = vector.shape_cast %313 : vector<8xf32> to vector<8x1xf32>
    %315 = vector.broadcast %314 : vector<8x1xf32> to vector<8x8xf32>
    %316 = arith.subf %312, %315 : vector<8x8xf32>
    %317 = math.exp %316 : vector<8x8xf32>
    %cst_259 = arith.constant dense<0.000000e+00> : vector<8xf32>
    %318 = vector.multi_reduction <add>, %317, %cst_259 [1] : vector<8x8xf32> to vector<8xf32>
    %319 = vector.shape_cast %318 : vector<8xf32> to vector<8x1xf32>
    %320 = tpu.reciprocal %319 {approx = true} : vector<8x1xf32> -> vector<8x1xf32>
    %321 = vector.broadcast %320 : vector<8x1xf32> to vector<8x8xf32>
    %322 = arith.mulf %317, %321 : vector<8x8xf32>
    %323 = arith.truncf %322 : vector<8x8xf32> to vector<8x8xbf16>
    %324 = arith.truncf %306 : vector<8x8xf32> to vector<8x8xbf16>
    %cst_260 = arith.constant dense<0.000000e+00> : vector<8x8xf32>
    %325 = tpu.matmul %323, %324, %cst_260 {dimension_numbers = #tpu.dot_dimension_numbers<[1], [0], [0], [1], [0, 0, 1, 1], [], []>} : vector<8x8xbf16>, vector<8x8xbf16>, vector<8x8xf32> -> vector<8x8xf32>
    %326 = arith.truncf %325 : vector<8x8xf32> to vector<8x8xbf16>
    %c0_261 = arith.constant 0 : index
    %c2_262 = arith.constant 2 : index
    %c0_263 = arith.constant 0 : index
    %c0_264 = arith.constant 0 : index
    %327 = vector.load %arg9[%c0_261, %c2_262, %c0_263, %c0_264] : memref<1x4x8x32xbf16, #tpu.memory_space<vmem>>, vector<1x1x8x32xbf16>
    %328 = vector.shape_cast %327 : vector<1x1x8x32xbf16> to vector<8x32xbf16>
    %cst_265 = arith.constant dense<0.000000e+00> : vector<8x32xf32>
    %329 = tpu.matmul %326, %328, %cst_265 {dimension_numbers = #tpu.dot_dimension_numbers<[1], [0], [0], [1], [0, 0, 1, 1], [], []>} : vector<8x8xbf16>, vector<8x32xbf16>, vector<8x32xf32> -> vector<8x32xf32>
    %330 = arith.addf %285, %329 : vector<8x32xf32>
    %c0_266 = arith.constant 0 : index
    %c3_267 = arith.constant 3 : index
    %c0_268 = arith.constant 0 : index
    %c0_269 = arith.constant 0 : index
    %331 = vector.load %arg3[%c0_266, %c3_267, %c0_268, %c0_269] : memref<1x4x32x8xbf16, #tpu.memory_space<vmem>>, vector<1x1x32x8xbf16>
    %332 = vector.shape_cast %331 : vector<1x1x32x8xbf16> to vector<32x8xbf16>
    %cst_270 = arith.constant dense<0.000000e+00> : vector<8x8xf32>
    %333 = tpu.matmul %194, %332, %cst_270 {dimension_numbers = #tpu.dot_dimension_numbers<[1], [0], [0], [1], [0, 0, 1, 1], [], []>} : vector<8x32xbf16>, vector<32x8xbf16>, vector<8x8xf32> -> vector<8x8xf32>
    %c0_271 = arith.constant 0 : index
    %c3_272 = arith.constant 3 : index
    %c0_273 = arith.constant 0 : index
    %c0_274 = arith.constant 0 : index
    %334 = vector.load %arg6[%c0_271, %c3_272, %c0_273, %c0_274] : memref<1x4x1x8xf32, #tpu.memory_space<vmem>>, vector<1x1x1x8xf32>
    %335 = vector.shape_cast %334 : vector<1x1x1x8xf32> to vector<1x8xf32>
    %336 = vector.broadcast %335 : vector<1x8xf32> to vector<8x8xf32>
    %337 = arith.addf %333, %336 : vector<8x8xf32>
    %c0_275 = arith.constant 0 : index
    %c3_276 = arith.constant 3 : index
    %c0_277 = arith.constant 0 : index
    %c0_278 = arith.constant 0 : index
    %338 = vector.load %arg4[%c0_275, %c3_276, %c0_277, %c0_278] : memref<1x4x32x8xbf16, #tpu.memory_space<vmem>>, vector<1x1x32x8xbf16>
    %339 = vector.shape_cast %338 : vector<1x1x32x8xbf16> to vector<32x8xbf16>
    %cst_279 = arith.constant dense<0.000000e+00> : vector<8x8xf32>
    %340 = tpu.matmul %194, %339, %cst_279 {dimension_numbers = #tpu.dot_dimension_numbers<[1], [0], [0], [1], [0, 0, 1, 1], [], []>} : vector<8x32xbf16>, vector<32x8xbf16>, vector<8x8xf32> -> vector<8x8xf32>
    %c0_280 = arith.constant 0 : index
    %c3_281 = arith.constant 3 : index
    %c0_282 = arith.constant 0 : index
    %c0_283 = arith.constant 0 : index
    %341 = vector.load %arg7[%c0_280, %c3_281, %c0_282, %c0_283] : memref<1x4x1x8xf32, #tpu.memory_space<vmem>>, vector<1x1x1x8xf32>
    %342 = vector.shape_cast %341 : vector<1x1x1x8xf32> to vector<1x8xf32>
    %343 = vector.broadcast %342 : vector<1x8xf32> to vector<8x8xf32>
    %344 = arith.addf %340, %343 : vector<8x8xf32>
    %c0_284 = arith.constant 0 : index
    %c3_285 = arith.constant 3 : index
    %c0_286 = arith.constant 0 : index
    %c0_287 = arith.constant 0 : index
    %345 = vector.load %arg5[%c0_284, %c3_285, %c0_286, %c0_287] : memref<1x4x32x8xbf16, #tpu.memory_space<vmem>>, vector<1x1x32x8xbf16>
    %346 = vector.shape_cast %345 : vector<1x1x32x8xbf16> to vector<32x8xbf16>
    %cst_288 = arith.constant dense<0.000000e+00> : vector<8x8xf32>
    %347 = tpu.matmul %194, %346, %cst_288 {dimension_numbers = #tpu.dot_dimension_numbers<[1], [0], [0], [1], [0, 0, 1, 1], [], []>} : vector<8x32xbf16>, vector<32x8xbf16>, vector<8x8xf32> -> vector<8x8xf32>
    %c0_289 = arith.constant 0 : index
    %c3_290 = arith.constant 3 : index
    %c0_291 = arith.constant 0 : index
    %c0_292 = arith.constant 0 : index
    %348 = vector.load %arg8[%c0_289, %c3_290, %c0_291, %c0_292] : memref<1x4x1x8xf32, #tpu.memory_space<vmem>>, vector<1x1x1x8xf32>
    %349 = vector.shape_cast %348 : vector<1x1x1x8xf32> to vector<1x8xf32>
    %350 = vector.broadcast %349 : vector<1x8xf32> to vector<8x8xf32>
    %351 = arith.addf %347, %350 : vector<8x8xf32>
    %352 = arith.truncf %337 : vector<8x8xf32> to vector<8x8xbf16>
    %353 = arith.truncf %344 : vector<8x8xf32> to vector<8x8xbf16>
    %cst_293 = arith.constant dense<0.000000e+00> : vector<8x8xf32>
    %354 = tpu.matmul %352, %353, %cst_293 {dimension_numbers = #tpu.dot_dimension_numbers<[1], [1], [0], [0], [0, 0, 1, 0], [], []>} : vector<8x8xbf16>, vector<8x8xbf16>, vector<8x8xf32> -> vector<8x8xf32>
    %cst_294 = arith.constant 0.353553385 : f32
    %355 = vector.broadcast %cst_294 : f32 to vector<8x8xf32>
    %356 = arith.mulf %354, %355 : vector<8x8xf32>
    %357 = arith.addf %356, %4 : vector<8x8xf32>
    %cst_295 = arith.constant dense<0xFF800000> : vector<8xf32>
    %358 = vector.multi_reduction <maximumf>, %357, %cst_295 [1] : vector<8x8xf32> to vector<8xf32>
    %359 = vector.shape_cast %358 : vector<8xf32> to vector<8x1xf32>
    %360 = vector.broadcast %359 : vector<8x1xf32> to vector<8x8xf32>
    %361 = arith.subf %357, %360 : vector<8x8xf32>
    %362 = math.exp %361 : vector<8x8xf32>
    %cst_296 = arith.constant dense<0.000000e+00> : vector<8xf32>
    %363 = vector.multi_reduction <add>, %362, %cst_296 [1] : vector<8x8xf32> to vector<8xf32>
    %364 = vector.shape_cast %363 : vector<8xf32> to vector<8x1xf32>
    %365 = tpu.reciprocal %364 {approx = true} : vector<8x1xf32> -> vector<8x1xf32>
    %366 = vector.broadcast %365 : vector<8x1xf32> to vector<8x8xf32>
    %367 = arith.mulf %362, %366 : vector<8x8xf32>
    %368 = arith.truncf %367 : vector<8x8xf32> to vector<8x8xbf16>
    %369 = arith.truncf %351 : vector<8x8xf32> to vector<8x8xbf16>
    %cst_297 = arith.constant dense<0.000000e+00> : vector<8x8xf32>
    %370 = tpu.matmul %368, %369, %cst_297 {dimension_numbers = #tpu.dot_dimension_numbers<[1], [0], [0], [1], [0, 0, 1, 1], [], []>} : vector<8x8xbf16>, vector<8x8xbf16>, vector<8x8xf32> -> vector<8x8xf32>
    %371 = arith.truncf %370 : vector<8x8xf32> to vector<8x8xbf16>
    %c0_298 = arith.constant 0 : index
    %c3_299 = arith.constant 3 : index
    %c0_300 = arith.constant 0 : index
    %c0_301 = arith.constant 0 : index
    %372 = vector.load %arg9[%c0_298, %c3_299, %c0_300, %c0_301] : memref<1x4x8x32xbf16, #tpu.memory_space<vmem>>, vector<1x1x8x32xbf16>
    %373 = vector.shape_cast %372 : vector<1x1x8x32xbf16> to vector<8x32xbf16>
    %cst_302 = arith.constant dense<0.000000e+00> : vector<8x32xf32>
    %374 = tpu.matmul %371, %373, %cst_302 {dimension_numbers = #tpu.dot_dimension_numbers<[1], [0], [0], [1], [0, 0, 1, 1], [], []>} : vector<8x8xbf16>, vector<8x32xbf16>, vector<8x32xf32> -> vector<8x32xf32>
    %375 = arith.addf %330, %374 : vector<8x32xf32>
    %c0_303 = arith.constant 0 : index
    %c0_304 = arith.constant 0 : index
    %c0_305 = arith.constant 0 : index
    %376 = vector.load %arg10[%c0_303, %c0_304, %c0_305] : memref<1x1x32xf32, #tpu.memory_space<vmem>>, vector<1x1x32xf32>
    %377 = vector.shape_cast %376 : vector<1x1x32xf32> to vector<1x32xf32>
    %378 = vector.broadcast %377 : vector<1x32xf32> to vector<8x32xf32>
    %379 = arith.addf %375, %378 : vector<8x32xf32>
    %c8 = arith.constant 8 : index
    %c0_306 = arith.constant 0 : index
    %380 = vector.load %arg23[%c8, %c0_306] : memref<16x32xf32, #tpu.memory_space<vmem>>, vector<8x32xf32>
    tpu.vector_store %arg23[%c8, %c0_306], %379 {strides = array<i32>} : memref<16x32xf32, #tpu.memory_space<vmem>>, vector<8x32xf32>,
    %c0_307 = arith.constant 0 : index
    %c0_308 = arith.constant 0 : index
    %381 = vector.load %arg23[%c0_307, %c0_308] : memref<16x32xf32, #tpu.memory_space<vmem>>, vector<16x32xf32>
    %382 = arith.addf %3, %381 : vector<16x32xf32>
    %c0_309 = arith.constant 0 : index
    %c0_310 = arith.constant 0 : index
    %c0_311 = arith.constant 0 : index
    %383 = vector.load %arg11[%c0_309, %c0_310, %c0_311] : memref<1x1x32xf32, #tpu.memory_space<vmem>>, vector<1x1x32xf32>
    %384 = vector.shape_cast %383 : vector<1x1x32xf32> to vector<1x32xf32>
    %c0_312 = arith.constant 0 : index
    %c0_313 = arith.constant 0 : index
    %c0_314 = arith.constant 0 : index
    %385 = vector.load %arg12[%c0_312, %c0_313, %c0_314] : memref<1x1x32xf32, #tpu.memory_space<vmem>>, vector<1x1x32xf32>
    %386 = vector.shape_cast %385 : vector<1x1x32xf32> to vector<1x32xf32>
    %cst_315 = arith.constant dense<0.000000e+00> : vector<16xf32>
    %387 = vector.multi_reduction <add>, %382, %cst_315 [1] : vector<16x32xf32> to vector<16xf32>
    %388 = vector.shape_cast %387 : vector<16xf32> to vector<16x1xf32>
    %cst_316 = arith.constant 3.200000e+01 : f32
    %389 = vector.broadcast %cst_316 : f32 to vector<16x1xf32>
    %390 = arith.divf %388, %389 : vector<16x1xf32>
    %391 = vector.broadcast %390 : vector<16x1xf32> to vector<16x32xf32>
    %392 = arith.subf %382, %391 : vector<16x32xf32>
    %393 = arith.mulf %392, %392 : vector<16x32xf32>
    %cst_317 = arith.constant dense<0.000000e+00> : vector<16xf32>
    %394 = vector.multi_reduction <add>, %393, %cst_317 [1] : vector<16x32xf32> to vector<16xf32>
    %395 = vector.shape_cast %394 : vector<16xf32> to vector<16x1xf32>
    %cst_318 = arith.constant 3.200000e+01 : f32
    %396 = vector.broadcast %cst_318 : f32 to vector<16x1xf32>
    %397 = arith.divf %395, %396 : vector<16x1xf32>
    %cst_319 = arith.constant 9.99999974E-6 : f32
    %398 = vector.broadcast %cst_319 : f32 to vector<16x1xf32>
    %399 = arith.addf %397, %398 : vector<16x1xf32>
    %400 = math.rsqrt %399 : vector<16x1xf32>
    %401 = vector.broadcast %400 : vector<16x1xf32> to vector<16x32xf32>
    %402 = arith.mulf %392, %401 : vector<16x32xf32>
    %403 = vector.broadcast %384 : vector<1x32xf32> to vector<16x32xf32>
    %404 = arith.mulf %402, %403 : vector<16x32xf32>
    %405 = vector.broadcast %386 : vector<1x32xf32> to vector<16x32xf32>
    %406 = arith.addf %404, %405 : vector<16x32xf32>
    %407 = arith.truncf %406 : vector<16x32xf32> to vector<16x32xbf16>
    %c0_320 = arith.constant 0 : index
    %c0_321 = arith.constant 0 : index
    %c0_322 = arith.constant 0 : index
    %408 = vector.load %arg13[%c0_320, %c0_321, %c0_322] : memref<1x32x64xbf16, #tpu.memory_space<vmem>>, vector<1x32x64xbf16>
    %409 = vector.shape_cast %408 : vector<1x32x64xbf16> to vector<32x64xbf16>
    %cst_323 = arith.constant dense<0.000000e+00> : vector<16x64xf32>
    %410 = tpu.matmul %407, %409, %cst_323 {dimension_numbers = #tpu.dot_dimension_numbers<[1], [0], [0], [1], [0, 0, 1, 1], [], []>} : vector<16x32xbf16>, vector<32x64xbf16>, vector<16x64xf32> -> vector<16x64xf32>
    %c0_324 = arith.constant 0 : index
    %c0_325 = arith.constant 0 : index
    %c0_326 = arith.constant 0 : index
    %411 = vector.load %arg14[%c0_324, %c0_325, %c0_326] : memref<1x1x64xf32, #tpu.memory_space<vmem>>, vector<1x1x64xf32>
    %412 = vector.shape_cast %411 : vector<1x1x64xf32> to vector<1x64xf32>
    %413 = vector.broadcast %412 : vector<1x64xf32> to vector<16x64xf32>
    %414 = arith.addf %410, %413 : vector<16x64xf32>
    %cst_327 = arith.constant 0.000000e+00 : f32
    %415 = vector.broadcast %cst_327 : f32 to vector<16x64xf32>
    %416 = arith.maximumf %414, %415 : vector<16x64xf32>
    %417 = arith.truncf %416 : vector<16x64xf32> to vector<16x64xbf16>
    %c0_328 = arith.constant 0 : index
    %c0_329 = arith.constant 0 : index
    %c0_330 = arith.constant 0 : index
    %418 = vector.load %arg15[%c0_328, %c0_329, %c0_330] : memref<1x64x32xbf16, #tpu.memory_space<vmem>>, vector<1x64x32xbf16>
    %419 = vector.shape_cast %418 : vector<1x64x32xbf16> to vector<64x32xbf16>
    %cst_331 = arith.constant dense<0.000000e+00> : vector<16x32xf32>
    %420 = tpu.matmul %417, %419, %cst_331 {dimension_numbers = #tpu.dot_dimension_numbers<[1], [0], [0], [1], [0, 0, 1, 1], [], []>} : vector<16x64xbf16>, vector<64x32xbf16>, vector<16x32xf32> -> vector<16x32xf32>
    %c0_332 = arith.constant 0 : index
    %c0_333 = arith.constant 0 : index
    %c0_334 = arith.constant 0 : index
    %421 = vector.load %arg16[%c0_332, %c0_333, %c0_334] : memref<1x1x32xf32, #tpu.memory_space<vmem>>, vector<1x1x32xf32>
    %422 = vector.shape_cast %421 : vector<1x1x32xf32> to vector<1x32xf32>
    %423 = vector.broadcast %422 : vector<1x32xf32> to vector<16x32xf32>
    %424 = arith.addf %420, %423 : vector<16x32xf32>
    %425 = arith.addf %406, %424 : vector<16x32xf32>
    %c0_335 = arith.constant 0 : index
    %c0_336 = arith.constant 0 : index
    %c0_337 = arith.constant 0 : index
    %426 = vector.load %arg17[%c0_335, %c0_336, %c0_337] : memref<1x1x32xf32, #tpu.memory_space<vmem>>, vector<1x1x32xf32>
    %427 = vector.shape_cast %426 : vector<1x1x32xf32> to vector<1x32xf32>
    %c0_338 = arith.constant 0 : index
    %c0_339 = arith.constant 0 : index
    %c0_340 = arith.constant 0 : index
    %428 = vector.load %arg18[%c0_338, %c0_339, %c0_340] : memref<1x1x32xf32, #tpu.memory_space<vmem>>, vector<1x1x32xf32>
    %429 = vector.shape_cast %428 : vector<1x1x32xf32> to vector<1x32xf32>
    %cst_341 = arith.constant dense<0.000000e+00> : vector<16xf32>
    %430 = vector.multi_reduction <add>, %425, %cst_341 [1] : vector<16x32xf32> to vector<16xf32>
    %431 = vector.shape_cast %430 : vector<16xf32> to vector<16x1xf32>
    %cst_342 = arith.constant 3.200000e+01 : f32
    %432 = vector.broadcast %cst_342 : f32 to vector<16x1xf32>
    %433 = arith.divf %431, %432 : vector<16x1xf32>
    %434 = vector.broadcast %433 : vector<16x1xf32> to vector<16x32xf32>
    %435 = arith.subf %425, %434 : vector<16x32xf32>
    %436 = arith.mulf %435, %435 : vector<16x32xf32>
    %cst_343 = arith.constant dense<0.000000e+00> : vector<16xf32>
    %437 = vector.multi_reduction <add>, %436, %cst_343 [1] : vector<16x32xf32> to vector<16xf32>
    %438 = vector.shape_cast %437 : vector<16xf32> to vector<16x1xf32>
    %cst_344 = arith.constant 3.200000e+01 : f32
    %439 = vector.broadcast %cst_344 : f32 to vector<16x1xf32>
    %440 = arith.divf %438, %439 : vector<16x1xf32>
    %cst_345 = arith.constant 9.99999974E-6 : f32
    %441 = vector.broadcast %cst_345 : f32 to vector<16x1xf32>
    %442 = arith.addf %440, %441 : vector<16x1xf32>
    %443 = math.rsqrt %442 : vector<16x1xf32>
    %444 = vector.broadcast %443 : vector<16x1xf32> to vector<16x32xf32>
    %445 = arith.mulf %435, %444 : vector<16x32xf32>
    %446 = vector.broadcast %427 : vector<1x32xf32> to vector<16x32xf32>
    %447 = arith.mulf %445, %446 : vector<16x32xf32>
    %448 = vector.broadcast %429 : vector<1x32xf32> to vector<16x32xf32>
    %449 = arith.addf %447, %448 : vector<16x32xf32>
    %c0_346 = arith.constant 0 : index
    %c0_347 = arith.constant 0 : index
    %450 = vector.load %arg22[%c0_346, %c0_347] : memref<16x32xf32, #tpu.memory_space<vmem>>, vector<16x32xf32>
    tpu.vector_store %arg22[%c0_346, %c0_347], %449 {strides = array<i32>} : memref<16x32xf32, #tpu.memory_space<vmem>>, vector<16x32xf32>,
    %c1_i32 = arith.constant 1 : i32
    %451 = arith.cmpi eq, %arg0, %c1_i32 : i32
    %452 = arith.extui %451 : i1 to i32
    %c0_i32_348 = arith.constant 0 : i32
    %453 = arith.cmpi ne, %452, %c0_i32_348 : i32
    scf.if %453 {
      %454 = arith.truncf %449 : vector<16x32xf32> to vector<16x32xbf16>
      %c0_349 = arith.constant 0 : index
      %c0_350 = arith.constant 0 : index
      %455 = vector.load %arg19[%c0_349, %c0_350] : memref<32x128xbf16, #tpu.memory_space<vmem>>, vector<32x128xbf16>
      %cst_351 = arith.constant dense<0.000000e+00> : vector<16x128xf32>
      %456 = tpu.matmul %454, %455, %cst_351 {dimension_numbers = #tpu.dot_dimension_numbers<[1], [0], [0], [1], [0, 0, 1, 1], [], []>} : vector<16x32xbf16>, vector<32x128xbf16>, vector<16x128xf32> -> vector<16x128xf32>
      %c0_352 = arith.constant 0 : index
      %c0_353 = arith.constant 0 : index
      %457 = vector.load %arg20[%c0_352, %c0_353] : memref<1x128xf32, #tpu.memory_space<vmem>>, vector<1x128xf32>
      %458 = vector.broadcast %457 : vector<1x128xf32> to vector<16x128xf32>
      %459 = arith.addf %456, %458 : vector<16x128xf32>
      %c0_354 = arith.constant 0 : index
      %c0_355 = arith.constant 0 : index
      %460 = vector.load %arg21[%c0_354, %c0_355] : memref<16x128xf32, #tpu.memory_space<vmem>>, vector<16x128xf32>
      tpu.vector_store %arg21[%c0_354, %c0_355], %459 {strides = array<i32>} : memref<16x128xf32, #tpu.memory_space<vmem>>, vector<16x128xf32>,
    } else {
    }
    return
  }
  func.func @transform_0(%arg0: i32) -> (i32, i32) {
    %c0_i32 = arith.constant 0 : i32
    %c0_i32_0 = arith.constant 0 : i32
    %c0_i32_1 = arith.constant 0 : i32
    return %c0_i32, %c0_i32_0 : i32, i32
  }
  func.func @transform_1(%arg0: i32) -> (i32, i32) {
    %c0_i32 = arith.constant 0 : i32
    %c0_i32_0 = arith.constant 0 : i32
    %c0_i32_1 = arith.constant 0 : i32
    return %c0_i32, %c0_i32_0 : i32, i32
  }
  func.func @transform_2(%arg0: i32) -> (i32, i32, i32, i32) {
    %c0_i32 = arith.constant 0 : i32
    %c0_i32_0 = arith.constant 0 : i32
    %c0_i32_1 = arith.constant 0 : i32
    %c0_i32_2 = arith.constant 0 : i32
    return %arg0, %c0_i32, %c0_i32_0, %c0_i32_1 : i32, i32, i32, i32
  }
  func.func @transform_3(%arg0: i32) -> (i32, i32, i32, i32) {
    %c0_i32 = arith.constant 0 : i32
    %c0_i32_0 = arith.constant 0 : i32
    %c0_i32_1 = arith.constant 0 : i32
    %c0_i32_2 = arith.constant 0 : i32
    return %arg0, %c0_i32, %c0_i32_0, %c0_i32_1 : i32, i32, i32, i32
  }
  func.func @transform_4(%arg0: i32) -> (i32, i32, i32, i32) {
    %c0_i32 = arith.constant 0 : i32
    %c0_i32_0 = arith.constant 0 : i32
    %c0_i32_1 = arith.constant 0 : i32
    %c0_i32_2 = arith.constant 0 : i32
    return %arg0, %c0_i32, %c0_i32_0, %c0_i32_1 : i32, i32, i32, i32
  }
  func.func @transform_5(%arg0: i32) -> (i32, i32, i32, i32) {
    %c0_i32 = arith.constant 0 : i32
    %c0_i32_0 = arith.constant 0 : i32
    %c0_i32_1 = arith.constant 0 : i32
    %c0_i32_2 = arith.constant 0 : i32
    return %arg0, %c0_i32, %c0_i32_0, %c0_i32_1 : i32, i32, i32, i32
  }
  func.func @transform_6(%arg0: i32) -> (i32, i32, i32, i32) {
    %c0_i32 = arith.constant 0 : i32
    %c0_i32_0 = arith.constant 0 : i32
    %c0_i32_1 = arith.constant 0 : i32
    %c0_i32_2 = arith.constant 0 : i32
    return %arg0, %c0_i32, %c0_i32_0, %c0_i32_1 : i32, i32, i32, i32
  }
  func.func @transform_7(%arg0: i32) -> (i32, i32, i32, i32) {
    %c0_i32 = arith.constant 0 : i32
    %c0_i32_0 = arith.constant 0 : i32
    %c0_i32_1 = arith.constant 0 : i32
    %c0_i32_2 = arith.constant 0 : i32
    return %arg0, %c0_i32, %c0_i32_0, %c0_i32_1 : i32, i32, i32, i32
  }
  func.func @transform_8(%arg0: i32) -> (i32, i32, i32, i32) {
    %c0_i32 = arith.constant 0 : i32
    %c0_i32_0 = arith.constant 0 : i32
    %c0_i32_1 = arith.constant 0 : i32
    %c0_i32_2 = arith.constant 0 : i32
    return %arg0, %c0_i32, %c0_i32_0, %c0_i32_1 : i32, i32, i32, i32
  }
  func.func @transform_9(%arg0: i32) -> (i32, i32, i32) {
    %c0_i32 = arith.constant 0 : i32
    %c0_i32_0 = arith.constant 0 : i32
    %c0_i32_1 = arith.constant 0 : i32
    return %arg0, %c0_i32, %c0_i32_0 : i32, i32, i32
  }
  func.func @transform_10(%arg0: i32) -> (i32, i32, i32) {
    %c0_i32 = arith.constant 0 : i32
    %c0_i32_0 = arith.constant 0 : i32
    %c0_i32_1 = arith.constant 0 : i32
    return %arg0, %c0_i32, %c0_i32_0 : i32, i32, i32
  }
  func.func @transform_11(%arg0: i32) -> (i32, i32, i32) {
    %c0_i32 = arith.constant 0 : i32
    %c0_i32_0 = arith.constant 0 : i32
    %c0_i32_1 = arith.constant 0 : i32
    return %arg0, %c0_i32, %c0_i32_0 : i32, i32, i32
  }
  func.func @transform_12(%arg0: i32) -> (i32, i32, i32) {
    %c0_i32 = arith.constant 0 : i32
    %c0_i32_0 = arith.constant 0 : i32
    %c0_i32_1 = arith.constant 0 : i32
    return %arg0, %c0_i32, %c0_i32_0 : i32, i32, i32
  }
  func.func @transform_13(%arg0: i32) -> (i32, i32, i32) {
    %c0_i32 = arith.constant 0 : i32
    %c0_i32_0 = arith.constant 0 : i32
    %c0_i32_1 = arith.constant 0 : i32
    return %arg0, %c0_i32, %c0_i32_0 : i32, i32, i32
  }
  func.func @transform_14(%arg0: i32) -> (i32, i32, i32) {
    %c0_i32 = arith.constant 0 : i32
    %c0_i32_0 = arith.constant 0 : i32
    %c0_i32_1 = arith.constant 0 : i32
    return %arg0, %c0_i32, %c0_i32_0 : i32, i32, i32
  }
  func.func @transform_15(%arg0: i32) -> (i32, i32, i32) {
    %c0_i32 = arith.constant 0 : i32
    %c0_i32_0 = arith.constant 0 : i32
    %c0_i32_1 = arith.constant 0 : i32
    return %arg0, %c0_i32, %c0_i32_0 : i32, i32, i32
  }
  func.func @transform_16(%arg0: i32) -> (i32, i32, i32) {
    %c0_i32 = arith.constant 0 : i32
    %c0_i32_0 = arith.constant 0 : i32
    %c0_i32_1 = arith.constant 0 : i32
    return %arg0, %c0_i32, %c0_i32_0 : i32, i32, i32
  }
  func.func @transform_17(%arg0: i32) -> (i32, i32, i32) {
    %c0_i32 = arith.constant 0 : i32
    %c0_i32_0 = arith.constant 0 : i32
    %c0_i32_1 = arith.constant 0 : i32
    return %arg0, %c0_i32, %c0_i32_0 : i32, i32, i32
  }
  func.func @transform_18(%arg0: i32) -> (i32, i32) {
    %c0_i32 = arith.constant 0 : i32
    %c0_i32_0 = arith.constant 0 : i32
    %c0_i32_1 = arith.constant 0 : i32
    return %c0_i32, %c0_i32_0 : i32, i32
  }
  func.func @transform_19(%arg0: i32) -> (i32, i32) {
    %c0_i32 = arith.constant 0 : i32
    %c0_i32_0 = arith.constant 0 : i32
    %c0_i32_1 = arith.constant 0 : i32
    return %c0_i32, %c0_i32_0 : i32, i32
  }
  func.func @transform_20(%arg0: i32) -> (i32, i32) {
    %c0_i32 = arith.constant 0 : i32
    %c0_i32_0 = arith.constant 0 : i32
    %c0_i32_1 = arith.constant 0 : i32
    return %c0_i32, %c0_i32_0 : i32, i32
  }
}

</mosaic_0001>

<bundles_post_ra>
// kernel: transformer_forward.1
= control target key start
LH: loop header
LB: loop body
LE: loop exit
PB: predicated region body
PF: predicated region fallthrough
CT: control target
= control target key end

     0   :  { %s5839_s0 = inlined_call_operand.vmem [shape: f32[16,32], index: 0, kind: input, shape index: {}]   ;;  %s5840_s1 = inlined_call_operand.vmem [shape: f32[8,8], index: 1, kind: input, shape index: {}]   ;;  %s5841_s2 = inlined_call_operand.vmem [shape: bf16[2,4,32,8], index: 2, kind: input, shape index: {}]   ;;  %s5842_s3 = inlined_call_operand.vmem [shape: bf16[2,4,32,8], index: 3, kind: input, shape index: {}]   ;;  %s5843_s4 = inlined_call_operand.vmem [shape: bf16[2,4,32,8], index: 4, kind: input, shape index: {}]   ;;  %s5844_s5 = inlined_call_operand.vmem [shape: f32[2,4,1,8], index: 5, kind: input, shape index: {}]   ;;  %s5845_s6 = inlined_call_operand.vmem [shape: f32[2,4,1,8], index: 6, kind: input, shape index: {}]   ;;  %s5846_s7 = inlined_call_operand.vmem [shape: f32[2,4,1,8], index: 7, kind: input, shape index: {}]   ;;  %s5847_s8 = inlined_call_operand.vmem [shape: bf16[2,4,8,32], index: 8, kind: input, shape index: {}]   ;;  %s5848_s9 = inlined_call_operand.vmem [shape: f32[2,1,32], index: 9, kind: input, shape index: {}]   ;;  %s5849_s10 = inlined_call_operand.vmem [shape: f32[2,1,32], index: 10, kind: input, shape index: {}]   ;;  %s5850_s11 = inlined_call_operand.vmem [shape: f32[2,1,32], index: 11, kind: input, shape index: {}]   ;;  %s5851_s12 = inlined_call_operand.vmem [shape: bf16[2,32,64], index: 12, kind: input, shape index: {}]   ;;  %s5852_s13 = inlined_call_operand.vmem [shape: f32[2,1,64], index: 13, kind: input, shape index: {}]   ;;  %s5853_s14 = inlined_call_operand.vmem [shape: bf16[2,64,32], index: 14, kind: input, shape index: {}]   ;;  %s5854_s15 = inlined_call_operand.vmem [shape: f32[2,1,32], index: 15, kind: input, shape index: {}]   ;;  %s5855_s16 = inlined_call_operand.vmem [shape: f32[2,1,32], index: 16, kind: input, shape index: {}]   ;;  %s5856_s17 = inlined_call_operand.vmem [shape: f32[2,1,32], index: 17, kind: input, shape index: {}]   ;;  %s5857_s18 = inlined_call_operand.vmem [shape: bf16[32,128], index: 18, kind: input, shape index: {}]   ;;  %s5858_s19 = inlined_call_operand.vmem [shape: f32[1,128], index: 19, kind: input, shape index: {}]   ;;  %s5859_s20 = inlined_call_operand.vmem [shape: f32[16,128], index: 20, kind: output, shape index: {}]  }
   0x1   :  { %5868 = sst [smem:[#allocation8_spill]] %s5839_s0 }
   0x2   :  { %5869 = sst [smem:[#allocation9_spill]] %s5840_s1  ;;  %s5199_s1 = smov 0  }
   0x3   :  { %5870 = sst [smem:[#allocation10_spill]] %s5841_s2 }
   0x4   :  { %5871 = sst [smem:[#allocation11_spill]] %s5842_s3 }
   0x5   :  { %5872 = sst [smem:[#allocation12_spill]] %s5843_s4 }
   0x6   :  { %5873 = sst [smem:[#allocation13_spill]] %s5844_s5 }
   0x7   :  { %5874 = sst [smem:[#allocation14_spill]] %s5845_s6 }
   0x8   :  { %5875 = sst [smem:[#allocation15_spill]] %s5846_s7 }
   0x9   :  { %5876 = sst [smem:[#allocation16_spill]] %s5847_s8 }
   0xa   :  { %5877 = sst [smem:[#allocation17_spill]] %s5848_s9 }
   0xb   :  { %5878 = sst [smem:[#allocation18_spill]] %s5857_s18 }
   0xc   :  { %5879 = sst [smem:[#allocation19_spill]] %s5858_s19 }
   0xd   :  { %5880 = sst [smem:[#allocation20_spill]] %s5859_s20 }
   0xe LB: > { %5881 = sst [smem:[#allocation4_spill]] %s5088_s1  ;;  %s5205_s22 = sadd.s32 4294967295, %s5088_s1   ;;  %s5088_s1 = sphi %s5199_s1, %s30_s1  }
   0xf   : > { %5882 = sst [smem:[#allocation5_spill]] %s5205_s22  ;;  %p4215_p0 = scmp.ge.s32.totalorder %s5088_s1, 1 }
  0x10   : > { %p690_p1 = scmp.lt.s32.totalorder %s5088_s1, 3 }
  0x12   : > { %p691_p2 = pnand %p4215_p0, %p690_p1 }
  0x14   : > { %694 = sbr.rel (%p691_p2) target bundleno = 8440 (0x20f8), region = 100 }
  0x19   : > { %p801_p3 = scmp.lt.s32.totalorder %s5205_s22, 1  ;;  %s5883_s26 = sld [smem:[#allocation10_spill]] }
  0x1a   : > { %s5885_s29 = sld [smem:[#allocation11_spill]] }
  0x1b   : > { %s5211_s23 = scalar_select %p801_p3, %s5205_s22, 1 }
  0x1c   : > { %s5886_s1 = sld [smem:[#allocation12_spill]] }
  0x1d   : > { %s4471_s24 = sshll.u32 %s5211_s23, 6  ;;  %s4222_s2 = sshll.u32 %s5211_s23, 2 }
  0x1e   : > { %s5888_s5 = sld [smem:[#allocation13_spill]]  ;;  %s863_s25 = scalar_lea.vmem %s5856_s17, %s5211_s23 }
  0x1f   : > { %s5218_s27 = scalar_lea.vmem %s5883_s26, %s4471_s24  ;;  %s5889_s6 = sld [smem:[#allocation14_spill]] }
  0x20   : > { %5884 = sst [smem:[#allocation6_spill]] %s5218_s27  ;;  %s5223_s30 = scalar_lea.vmem %s5885_s29, %s4471_s24 }
  0x21   : > { %s5890_s7 = sld [smem:[#allocation15_spill]]  ;;  %s4474_s27 = sshll.u32 %s5211_s23, 4 }
  0x22   : > { %s5228_s20 = scalar_lea.vmem %s5886_s1, %s4471_s24  ;;  %s5892_s8 = sld [smem:[#allocation16_spill]] }
  0x23   : > { %5887 = sst [smem:[#allocation7_spill]] %s5228_s20  ;;  %s4476_s20 = sshll.u32 %s5211_s23, 5 }
  0x24   : > { %s5233_s22 = scalar_lea.vmem %s5888_s5, %s4222_s2  ;;  %s5276_s9 = scalar_lea.vmem %s5853_s14, %s4476_s20 }
  0x25   : > { %s5238_s26 = scalar_lea.vmem %s5889_s6, %s4222_s2  ;;  %s857_s6 = scalar_lea.vmem %s5854_s15, %s5211_s23 }
  0x26   : > { %s5893_s0 = sld [smem:[#allocation5_spill]] }
  0x27   : > { %s5243_s29 = scalar_lea.vmem %s5890_s7, %s4222_s2  ;;  %s5266_s7 = scalar_lea.vmem %s5851_s12, %s4474_s27 }
  0x28   : > { %s5253_s18 = scalar_lea.vmem %s5892_s8, %s4474_s27  ;;  %s860_s2 = scalar_lea.vmem %s5855_s16, %s5211_s23 }
  0x2c   : > { %p4231_p4 = scmp.ne.s32.totalorder %s5893_s0, 0 }
  0x2d   : > { %s5894_s8 = sld [smem:[#allocation8_spill]] (!%p4231_p4) }
  0x2e   : > { %868 = sbr.rel (%p4231_p4) target bundleno = 53 (0x35), region = 104 }
  0x33   : > { %v869_v0 = vld [vmem:[%s5894_s8] sm:$0xff]  ;;  %vm871_vm0 = vcmask 261120   ;;  %v870_v1 = vld [vmem:[%s5894_s8 + $0x8] sm:$0xff] }
  0x34   : > { %872 = vst.msk [vmem:[#allocation2] sm:$0xff] %vm871_vm0, %v869_v0  ;;  %873 = vst.msk [vmem:[#allocation2 + $0x8] sm:$0xff] %vm871_vm0, %v870_v1 }
  0x35 PF: > { %s5895_s28 = sld [smem:[#allocation6_spill]]  ;;  %v4984_v2 = vld [vmem:[%s5223_s30 + $0x8] sm:$0xff]   ;;  %v5090_v3 = vmov 0.0   ;;  %v4986_v5 = vld [vmem:[%s5223_s30] sm:$0xff]   ;;  %vm5091_vm1 = vmmov 0   ;;  %vm901_vm2 = vcmask 261120   ;;  %s5901_s24 = scalar_lea.vmem %s5850_s11, %s5211_s23 }
  0x36   : > { %4616 = vmatprep.subr.bf16.mxu1 %v5090_v3  ;;  %4608 = vmatprep.subr.bf16.mxu0 %v5090_v3  ;;  %v5322_v9 = vld [vmem:[%s5238_s26] ss:$0 sm:$0xff]  ;;  %vm1073_vm3 = vcmask 64512   ;;  %s5896_s1 = sld [smem:[#allocation7_spill]]  ;;  %vm1138_vm4 = vcmask 1043456   ;;  %v4990_v52 = vld [vmem:[%s5223_s30 + $0x18] sm:$0xff]   ;;  %s5902_s5 = scalar_lea.vmem %s5852_s13, %s5211_s23 }
  0x37   : > { %4617 = vmatpush3.bf16.msra.mxu1 %v4984_v2  ;;  %4620 = vmatprep.mubr.msk.bf16.mxu1 %vm5091_vm1, %v5090_v3  ;;  %v5326_v13 = vld [vmem:[%s5233_s22] ss:$0 sm:$0xff]  ;;  %s5897_s3 = sld [smem:[#allocation9_spill]]  ;;  %v4992_v54 = vld [vmem:[%s5223_s30 + $0x10] sm:$0xff]   ;;  %v5378_v63 = vld [vmem:[%s5238_s26 + $0x1] ss:$0 sm:$0xff] }
  0x38   : > { %4618 = vmatprep.subr.bf16.mxu1 %v5090_v3  ;;  %4612 = vmatprep.mubr.msk.bf16.mxu0 %vm5091_vm1, %v5090_v3  ;;  %v5351_v39 = vld [vmem:[%s5243_s29] ss:$0 sm:$0xff]  ;;  %v5382_v2 = vld [vmem:[%s5233_s22 + $0x1] ss:$0 sm:$0xff]  ;;  %vm3858_vm5 = vcmask 523264  }
  0x3b   : > { %v4985_v4 = vld [vmem:[%s5895_s28 + $0x8] sm:$0xff]   ;;  %v4987_v6 = vld [vmem:[%s5895_s28] sm:$0xff]   ;;  %4619 = vmatpush3.bf16.msra.mxu1 %v4986_v5  ;;  %v4991_v47 = vld [vmem:[%s5895_s28 + $0x18] sm:$0xff]  }
  0x3c   : > { %4609 = vmatpush3.bf16.msra.mxu0 %v4985_v4  ;;  %v874_v7 = vld [vmem:[#allocation2] sm:$0xff]  ;;  %4632 = vmatprep.subr.bf16.mxu1 %v5090_v3  ;;  %v4988_v24 = vld [vmem:[%s5896_s1 + $0x8] sm:$0xff]   ;;  %v4993_v48 = vld [vmem:[%s5895_s28 + $0x10] sm:$0xff]  }
  0x3d   : > { %4610 = vmatprep.subr.bf16.mxu0 %v5090_v3  ;;  %v5309_v8 = vpack.c.bf16 %v874_v7, %v874_v7  ;;  %v4989_v25 = vld [vmem:[%s5896_s1] sm:$0xff]  }
  0x3e   : > { %v5345_v27 = vld [vmem:[%s5897_s3] sm:$0xff] }
  0x3f   : > { %4621 = vmatmul.mubr.msk.bf16.vlgmr.msra.gmra.mxu1 %vm901_vm2, %v5309_v8 }
  0x40   : > { %4611 = vmatpush3.bf16.msra.mxu0 %v4987_v6  ;;  %4634 = vmatprep.mubr.msk.bf16.mxu1 %vm5091_vm1, %v5090_v3 }
  0x41   : > { %4624 = vmatprep.subr.bf16.mxu0 %v5090_v3 }
  0x43   : > { %4613 = vmatmul.mubr.msk.bf16.vlgmr.msra.gmra.mxu0 %vm901_vm2, %v5309_v8 }
  0x44   : > { %4628 = vmatprep.mubr.msk.bf16.mxu0 %vm5091_vm1, %v5090_v3  ;;  %4625 = vmatpush3.bf16.msra.mxu0 %v4988_v24 }
  0x45   : > { %4626 = vmatprep.subr.bf16.mxu0 %v5090_v3 }
  0x48   : > { %4627 = vmatpush3.bf16.msra.mxu0 %v4989_v25 }
  0x49   : > { %4638 = vmatprep.subr.bf16.mxu0 %v5090_v3 }
  0x4b   : > { %4629 = vmatmul.mubr.msk.bf16.vlgmr.msra.gmra.mxu0 %vm901_vm2, %v5309_v8 }
  0x4c   : > { %4640 = vmatprep.mubr.msk.bf16.mxu0 %vm5091_vm1, %v5090_v3 }
  0xff   : > { %v1002_v10 = vpop.f32.mrf.mxu1 }
 0x100   : > { %v1003_v11 = vadd.f32 %v5322_v9, %v1002_v10 }
 0x101   : > { %v4622_v14 = vpop.f32.mrf.mxu1 }
 0x102   : > { %v1072_v15 = vpack.c.bf16 %v1003_v11, %v1003_v11  ;;  %v4994_v14 = vld [vmem:[%s5896_s1 + $0x18] sm:$0xff]  }
 0x103   : > { %v939_v12 = vpop.f32.mrf.mxu0  ;;  %v1005_v17 = vpop.f32.mrf.mxu1 }
 0x104   : > { %v1078_v18 = vsel %vm1073_vm3, %v1072_v15, 0  ;;  %v940_v19 = vadd.f32 %v5326_v13, %v939_v12  ;;  %v4995_v15 = vld [vmem:[%s5896_s1 + $0x10] sm:$0xff]  }
 0x105   : > { %v4614_v16 = vpop.f32.mrf.mxu0  ;;  %v4623_v21 = vpop.f32.mrf.mxu1  ;;  %4633 = vmatpush3.bf16.xpose.msra.mxu1 %v1078_v18 }
 0x106   : > { %4644 = vmatprep.subr.bf16.mxu1 %v5090_v3  ;;  %v1071_v23 = vpack.c.bf16 %v940_v19, %v940_v19 }
 0x107   : > { %v942_v20 = vpop.f32.mrf.mxu0 }
 0x109   : > { %v4615_v22 = vpop.f32.mrf.mxu0 }
 0x10b   : > { %v1065_v40 = vpop.f32.mrf.mxu0 }
 0x10c   : > { %4635 = vmatmul.mubr.msk.bf16.vlgmr.msra.gmra.mxu1 %vm1073_vm3, %v1071_v23  ;;  %v1066_v41 = vadd.f32 %v5351_v39, %v1065_v40  ;;  %v5401_v23 = vld [vmem:[%s5243_s29 + $0x1] ss:$0 sm:$0xff] }
 0x10d   : > { %4648 = vmatprep.mubr.msk.bf16.mxu1 %vm5091_vm1, %v5090_v3  ;;  %v4630_v42 = vpop.f32.mrf.mxu0  ;;  %4645 = vmatpush3.bf16.msra.mxu1 %v4991_v47 }
 0x10e   : > { %v1134_v43 = vpack.c.bf16 %v1066_v41, %v1066_v41  ;;  %4646 = vmatprep.subr.bf16.mxu1 %v5090_v3  ;;  %v1183_v42 = vld [vmem:[%s5253_s18] sm:$0xf] }
 0x10f   : > { %v1068_v44 = vpop.f32.mrf.mxu0 }
 0x110   : > { %v1140_v45 = vsel %vm1138_vm4, %v1134_v43, 0 }
 0x111   : > { %v4631_v46 = vpop.f32.mrf.mxu0  ;;  %4639 = vmatpush3.bf16.msra.mxu0 %v1140_v45  ;;  %4647 = vmatpush3.bf16.msra.mxu1 %v4993_v48  ;;  %v1541_v45 = vsel %vm1138_vm4, %v1183_v42, 0  ;;  %v4997_v48 = vld [vmem:[%s5223_s30 + $0x20] sm:$0xff]  }
 0x112   : > { %4652 = vmatprep.subr.bf16.mxu0 %v5090_v3  ;;  %4660 = vmatprep.subr.bf16.mxu1 %v5090_v3  ;;  %v4996_v46 = vld [vmem:[%s5223_s30 + $0x28] sm:$0xff]  }
 0x114   : > { %4649 = vmatmul.mubr.msk.bf16.vlgmr.msra.gmra.mxu1 %vm901_vm2, %v5309_v8 }
 0x115   : > { %4664 = vmatprep.mubr.msk.bf16.mxu1 %vm5091_vm1, %v5090_v3  ;;  %4661 = vmatpush3.bf16.msra.mxu1 %v4994_v14  ;;  %v5451_v14 = vld [vmem:[%s5233_s22 + $0x2] ss:$0 sm:$0xff] }
 0x116   : > { %4662 = vmatprep.subr.bf16.mxu1 %v5090_v3 }
 0x119   : > { %4663 = vmatpush3.bf16.msra.mxu1 %v4995_v15 }
 0x11a   : > { %4674 = vmatprep.subr.bf16.mxu1 %v5090_v3 }
 0x11c   : > { %4665 = vmatmul.mubr.msk.bf16.vlgmr.msra.gmra.mxu1 %vm901_vm2, %v5309_v8 }
 0x11d   : > { %4676 = vmatprep.mubr.msk.bf16.mxu1 %vm5091_vm1, %v5090_v3 }
 0x1cc   : > { %v1114_v26 = vpop.f32.mrf.mxu1 }
 0x1cd   : > { %v1120_v28 = vmul.f32 0.35355338, %v1114_v26 }
 0x1ce   : > { %v4636_v29 = vpop.f32.mrf.mxu1 }
 0x1cf   : > { %v1121_v30 = vadd.f32 %v1120_v28, %v5345_v27 }
 0x1d0   : > { %v1117_v31 = vpop.f32.mrf.mxu1 }
 0x1d1   : > { %v1122_v32 = vsel %vm1073_vm3, %v1121_v30, -inf }
 0x1d2   : > { %1123 = vmax.xlane.f32.xlu0 %v1122_v32  ;;  %v4637_v33 = vpop.f32.mrf.mxu1 }
 0x1d4   : > { %v1243_v55 = vpop.f32.mrf.mxu1 }
 0x1d5   : > { %v1244_v10 = vadd.f32 %v5382_v2, %v1243_v55 }
 0x1d6   : > { %v4650_v56 = vpop.f32.mrf.mxu1 }
 0x1d7   : > { %v1379_v12 = vpack.c.bf16 %v1244_v10, %v1244_v10 }
 0x1d8   : > { %v1246_v57 = vpop.f32.mrf.mxu1 }
 0x1da   : > { %v4651_v58 = vpop.f32.mrf.mxu1 }
 0x1dc   : > { %v1373_v24 = vpop.f32.mrf.mxu1 }
 0x1dd   : > { %v1374_v25 = vadd.f32 %v5401_v23, %v1373_v24 }
 0x1de   : > { %v4666_v26 = vpop.f32.mrf.mxu1 }
 0x1df   : > { %v1441_v28 = vpack.c.bf16 %v1374_v25, %v1374_v25 }
 0x1e0   : > { %v1376_v29 = vpop.f32.mrf.mxu1 }
 0x1e2   : > { %v4667_v31 = vpop.f32.mrf.mxu1 }
 0x25b   : > { %v1124_v34 = vpop.xlane.xlu0 %1123 }
 0x25c   : > { %v1125_v35 = vsub.f32 %v1121_v30, %v1124_v34  ;;  %v1446_v30 = vsel %vm1138_vm4, %v1441_v28, 0 }
 0x25d   : > { %4675 = vmatpush3.bf16.msra.mxu1 %v1446_v30 }
 0x25e   : > { %v1126_v36 = vmul.f32 1.442695, %v1125_v35  ;;  %4686 = vmatprep.subr.bf16.mxu1 %v5090_v3 }
 0x260   : > { %5038 = vpow2.f32 %v1126_v36 }
 0x26d   : > { %v5039_v37 = vpop.eup %5038 }
 0x26e   : > { %v1128_v38 = vsel %vm1073_vm3, %v5039_v37, 0.0 }
 0x26f   : > { %1129 = vadd.xlane.f32.xlu0 %v1128_v38 }
 0x2f8   : > { %v1130_v49 = vpop.xlane.xlu0 %1129 }
 0x2f9   : > { %5040 = vrcp.f32 %v1130_v49 }
 0x306   : > { %v5041_v50 = vpop.eup %5040 }
 0x307   : > { %v1132_v51 = vmul.f32 %v5041_v50, %v5039_v37  ;;  %v4275_v37 = vld [vmem:[%s5253_s18 + $0x4] sm:$0xf]  ;;  %v4998_v50 = vld [vmem:[%s5895_s28 + $0x28] sm:$0xff]  }
 0x308   : > { %v1495_v38 = vsel %vm1138_vm4, %v4275_v37, 0  ;;  %v5469_v37 = vld [vmem:[%s5243_s29 + $0x2] ss:$0 sm:$0xff] }
 0x309   : > { %v1133_v53 = vpack.c.bf16 %v1132_v51, %v1132_v51 }
 0x30b   : > { %4641 = vmatmul.mubr.msk.bf16.vlgmr.msra.gmra.mxu0 %vm1073_vm3, %v1133_v53 }
 0x30c   : > { %4653 = vmatpush3.bf16.msra.mxu0 %v4990_v52  ;;  %4656 = vmatprep.mubr.msk.bf16.mxu0 %vm5091_vm1, %v5090_v3 }
 0x30d   : > { %4654 = vmatprep.subr.bf16.mxu0 %v5090_v3 }
 0x310   : > { %4655 = vmatpush3.bf16.msra.mxu0 %v4992_v54  ;;  %v4999_v54 = vld [vmem:[%s5895_s28 + $0x20] sm:$0xff]  }
 0x311   : > { %4668 = vmatprep.subr.bf16.mxu0 %v5090_v3 }
 0x313   : > { %4657 = vmatmul.mubr.msk.bf16.vlgmr.msra.gmra.mxu0 %vm901_vm2, %v5309_v8 }
 0x314   : > { %4670 = vmatprep.mubr.msk.bf16.mxu0 %vm5091_vm1, %v5090_v3 }
 0x3cb   : > { %v5375_v59 = vpop.f32.mrf.mxu0 }
 0x3cc   : > { %v1182_v47 = vpack.c.bf16 %v5375_v59, %v5375_v59 }
 0x3cd   : > { %v4642_v60 = vpop.f32.mrf.mxu0 }
 0x3ce   : > { %v5443_v60 = vld [vmem:[%s5238_s26 + $0x2] ss:$0 sm:$0xff] }
 0x3cf   : > { %v1179_v61 = vpop.f32.mrf.mxu0 }
 0x3d1   : > { %v4643_v62 = vpop.f32.mrf.mxu0 }
 0x3d3   : > { %v1308_v0 = vpop.f32.mrf.mxu0 }
 0x3d4   : > { %v1309_v1 = vadd.f32 %v5378_v63, %v1308_v0 }
 0x3d5   : > { %v4658_v4 = vpop.f32.mrf.mxu0 }
 0x3d6   : > { %v1380_v5 = vpack.c.bf16 %v1309_v1, %v1309_v1 }
 0x3d7   : > { %v1311_v6 = vpop.f32.mrf.mxu0 }
 0x3d8   : > { %v1385_v7 = vsel %vm1073_vm3, %v1380_v5, 0 }
 0x3d9   : > { %v4659_v11 = vpop.f32.mrf.mxu0  ;;  %4669 = vmatpush3.bf16.xpose.msra.mxu0 %v1385_v7 }
 0x3da   : > { %4680 = vmatprep.subr.bf16.mxu0 %v5090_v3 }
 0x3e0   : > { %4671 = vmatmul.mubr.msk.bf16.vlgmr.msra.gmra.mxu0 %vm1073_vm3, %v1379_v12 }
 0x3e1   : > { %4682 = vmatprep.mubr.msk.bf16.mxu0 %vm5091_vm1, %v5090_v3  ;;  %4681 = vmatpush3.bf16.msra.mxu0 %v1495_v38 }
 0x3e2   : > { %4692 = vmatprep.subr.bf16.mxu0 %v5090_v3 }
 0x4a0   : > { %v1421_v16 = vpop.f32.mrf.mxu0 }
 0x4a1   : > { %v1427_v17 = vmul.f32 0.35355338, %v1421_v16 }
 0x4a2   : > { %v4672_v18 = vpop.f32.mrf.mxu0 }
 0x4a3   : > { %v1428_v19 = vadd.f32 %v1427_v17, %v5345_v27 }
 0x4a4   : > { %v1424_v20 = vpop.f32.mrf.mxu0 }
 0x4a5   : > { %v1429_v21 = vsel %vm1073_vm3, %v1428_v19, -inf }
 0x4a6   : > { %1430 = vmax.xlane.f32.xlu1 %v1429_v21  ;;  %v4673_v22 = vpop.f32.mrf.mxu0  ;;  %v5000_v21 = vld [vmem:[%s5896_s1 + $0x28] sm:$0xff]  }
 0x4a7   : > { %v5001_v22 = vld [vmem:[%s5896_s1 + $0x20] sm:$0xff]  }
 0x52f   : > { %v1431_v32 = vpop.xlane.xlu1 %1430 }
 0x530   : > { %v1432_v33 = vsub.f32 %v1428_v19, %v1431_v32 }
 0x532   : > { %v1433_v34 = vmul.f32 1.442695, %v1432_v33 }
 0x534   : > { %5042 = vpow2.f32 %v1433_v34 }
 0x541   : > { %v5043_v35 = vpop.eup %5042 }
 0x542   : > { %v1435_v36 = vsel %vm1073_vm3, %v5043_v35, 0.0 }
 0x543   : > { %1436 = vadd.xlane.f32.xlu1 %v1435_v36 }
 0x5cc   : > { %v1437_v40 = vpop.xlane.xlu1 %1436 }
 0x5cd   : > { %5044 = vrcp.f32 %v1437_v40 }
 0x5da   : > { %v5045_v41 = vpop.eup %5044 }
 0x5db   : > { %v1439_v43 = vmul.f32 %v5045_v41, %v5043_v35 }
 0x5dd   : > { %v1440_v44 = vpack.c.bf16 %v1439_v43, %v1439_v43 }
 0x5df   : > { %4677 = vmatmul.mubr.msk.bf16.vlgmr.msra.gmra.mxu1 %vm1073_vm3, %v1440_v44 }
 0x5e0   : > { %4687 = vmatpush3.bf16.msra.mxu1 %v1541_v45  ;;  %4688 = vmatprep.mubr.msk.bf16.mxu1 %vm5091_vm1, %v5090_v3 }
 0x5e1   : > { %4700 = vmatprep.subr.bf16.mxu1 %v5090_v3 }
 0x5e7   : > { %4689 = vmatmul.mubr.msk.bf16.vlgmr.msra.gmra.mxu1 %vm1073_vm3, %v1182_v47 }
 0x5e8   : > { %4701 = vmatpush3.bf16.msra.mxu1 %v4996_v46  ;;  %4704 = vmatprep.mubr.msk.bf16.mxu1 %vm5091_vm1, %v5090_v3  ;;  %v4307_v46 = vld [vmem:[%s5253_s18 + $0x8] sm:$0xf] }
 0x5e9   : > { %4702 = vmatprep.subr.bf16.mxu1 %v5090_v3  ;;  %v1894_v47 = vsel %vm1138_vm4, %v4307_v46, 0 }
 0x5ec   : > { %4703 = vmatpush3.bf16.msra.mxu1 %v4997_v48 }
 0x5ed   : > { %4716 = vmatprep.subr.bf16.mxu1 %v5090_v3 }
 0x5ef   : > { %4705 = vmatmul.mubr.msk.bf16.vlgmr.msra.gmra.mxu1 %vm901_vm2, %v5309_v8 }
 0x5f0   : > { %4718 = vmatprep.mubr.msk.bf16.mxu1 %vm5091_vm1, %v5090_v3 }
 0x69f   : > { %v1482_v49 = vpop.f32.mrf.mxu1 }
 0x6a0   : > { %v1488_v51 = vpack.c.bf16 %v1482_v49, %v1482_v49 }
 0x6a1   : > { %v4678_v52 = vpop.f32.mrf.mxu1 }
 0x6a2   : > { %4683 = vmatmul.mubr.msk.bf16.vlgmr.msra.gmra.mxu0 %vm1073_vm3, %v1488_v51  ;;  %v5003_v52 = vld [vmem:[%s5895_s28 + $0x38] sm:$0xff]  }
 0x6a3   : > { %v1485_v53 = vpop.f32.mrf.mxu1  ;;  %4693 = vmatpush3.bf16.msra.mxu0 %v4998_v50  ;;  %4696 = vmatprep.mubr.msk.bf16.mxu0 %vm5091_vm1, %v5090_v3 }
 0x6a4   : > { %4694 = vmatprep.subr.bf16.mxu0 %v5090_v3  ;;  %v5005_v53 = vld [vmem:[%s5895_s28 + $0x30] sm:$0xff]  }
 0x6a5   : > { %v4679_v55 = vpop.f32.mrf.mxu1 }
 0x6a6   : > { %v5002_v55 = vld [vmem:[%s5223_s30 + $0x38] sm:$0xff]  }
 0x6a7   : > { %v5435_v56 = vpop.f32.mrf.mxu1  ;;  %4695 = vmatpush3.bf16.msra.mxu0 %v4999_v54 }
 0x6a8   : > { %4708 = vmatprep.subr.bf16.mxu0 %v5090_v3 }
 0x6a9   : > { %v4690_v57 = vpop.f32.mrf.mxu1 }
 0x6aa   : > { %4697 = vmatmul.mubr.msk.bf16.vlgmr.msra.gmra.mxu0 %vm901_vm2, %v5309_v8 }
 0x6ab   : > { %v1580_v58 = vpop.f32.mrf.mxu1  ;;  %4712 = vmatprep.mubr.msk.bf16.mxu0 %vm5091_vm1, %v5090_v3  ;;  %4709 = vmatpush3.bf16.msra.mxu0 %v5000_v21 }
 0x6ac   : > { %4710 = vmatprep.subr.bf16.mxu0 %v5090_v3 }
 0x6ad   : > { %v4691_v59 = vpop.f32.mrf.mxu1 }
 0x6af   : > { %v1707_v61 = vpop.f32.mrf.mxu1  ;;  %4711 = vmatpush3.bf16.msra.mxu0 %v5001_v22 }
 0x6b0   : > { %v1708_v62 = vadd.f32 %v5443_v60, %v1707_v61  ;;  %4722 = vmatprep.subr.bf16.mxu0 %v5090_v3  ;;  %v5004_v61 = vld [vmem:[%s5223_s30 + $0x30] sm:$0xff]  }
 0x6b1   : > { %v4706_v0 = vpop.f32.mrf.mxu1 }
 0x6b2   : > { %v1779_v1 = vpack.c.bf16 %v1708_v62, %v1708_v62  ;;  %4713 = vmatmul.mubr.msk.bf16.vlgmr.msra.gmra.mxu0 %vm901_vm2, %v5309_v8 }
 0x6b3   : > { %v1710_v4 = vpop.f32.mrf.mxu1  ;;  %4724 = vmatprep.mubr.msk.bf16.mxu0 %vm5091_vm1, %v5090_v3 }
 0x6b4   : > { %v1784_v5 = vsel %vm1073_vm3, %v1779_v1, 0 }
 0x6b5   : > { %v4707_v6 = vpop.f32.mrf.mxu1  ;;  %4717 = vmatpush3.bf16.xpose.msra.mxu1 %v1784_v5 }
 0x6b6   : > { %4728 = vmatprep.subr.bf16.mxu1 %v5090_v3 }
 0x762   : > { %v5448_v7 = vpop.f32.mrf.mxu0 }
 0x763   : > { %v1578_v6 = vadd.f32 %v5435_v56, %v5448_v7 }
 0x764   : > { %v4684_v10 = vpop.f32.mrf.mxu0 }
 0x766   : > { %v1534_v11 = vpop.f32.mrf.mxu0 }
 0x768   : > { %v4685_v12 = vpop.f32.mrf.mxu0 }
 0x76a   : > { %v1642_v15 = vpop.f32.mrf.mxu0 }
 0x76b   : > { %v1643_v16 = vadd.f32 %v5451_v14, %v1642_v15 }
 0x76c   : > { %v4698_v17 = vpop.f32.mrf.mxu0 }
 0x76d   : > { %v1778_v18 = vpack.c.bf16 %v1643_v16, %v1643_v16  ;;  %v5504_v17 = vld [vmem:[%s5238_s26 + $0x3] ss:$0 sm:$0xff] }
 0x76e   : > { %v1645_v19 = vpop.f32.mrf.mxu0 }
 0x76f   : > { %4719 = vmatmul.mubr.msk.bf16.vlgmr.msra.gmra.mxu1 %vm1073_vm3, %v1778_v18 }
 0x770   : > { %v4699_v20 = vpop.f32.mrf.mxu0  ;;  %4730 = vmatprep.mubr.msk.bf16.mxu1 %vm5091_vm1, %v5090_v3  ;;  %4729 = vmatpush3.bf16.msra.mxu1 %v1894_v47 }
 0x771   : > { %4742 = vmatprep.subr.bf16.mxu1 %v5090_v3  ;;  %v5508_v20 = vld [vmem:[%s5233_s22 + $0x3] ss:$0 sm:$0xff] }
 0x772   : > { %v1772_v38 = vpop.f32.mrf.mxu0 }
 0x773   : > { %v1773_v40 = vadd.f32 %v5469_v37, %v1772_v38 }
 0x774   : > { %v4714_v41 = vpop.f32.mrf.mxu0 }
 0x775   : > { %v1840_v42 = vpack.c.bf16 %v1773_v40, %v1773_v40 }
 0x776   : > { %v1775_v43 = vpop.f32.mrf.mxu0 }
 0x777   : > { %v1845_v44 = vsel %vm1138_vm4, %v1840_v42, 0  ;;  %v5528_v43 = vld [vmem:[%s5243_s29 + $0x3] ss:$0 sm:$0xff]  ;;  %s5898_s29 = sld [smem:[#allocation17_spill]] }
 0x778   : > { %v4715_v45 = vpop.f32.mrf.mxu0  ;;  %4723 = vmatpush3.bf16.msra.mxu0 %v1845_v44 }
 0x779   : > { %4734 = vmatprep.subr.bf16.mxu0 %v5090_v3 }
 0x77d   : > { %s5899_s27 = scalar_lea.vmem %s5898_s29, %s5211_s23 }
 0x82f   : > { %v1820_v24 = vpop.f32.mrf.mxu1 }
 0x830   : > { %v1826_v25 = vmul.f32 0.35355338, %v1820_v24 }
 0x831   : > { %v4720_v26 = vpop.f32.mrf.mxu1 }
 0x832   : > { %v1827_v28 = vadd.f32 %v1826_v25, %v5345_v27 }
 0x833   : > { %v1823_v29 = vpop.f32.mrf.mxu1 }
 0x834   : > { %v1828_v30 = vsel %vm1073_vm3, %v1827_v28, -inf  ;;  %v5007_v29 = vld [vmem:[%s5896_s1 + $0x30] sm:$0xff]  }
 0x835   : > { %1829 = vmax.xlane.f32.xlu0 %v1828_v30  ;;  %v4721_v31 = vpop.f32.mrf.mxu1 }
 0x8be   : > { %v1830_v32 = vpop.xlane.xlu0 %1829 }
 0x8bf   : > { %v1831_v33 = vsub.f32 %v1827_v28, %v1830_v32  ;;  %v5006_v28 = vld [vmem:[%s5896_s1 + $0x38] sm:$0xff]  }
 0x8c1   : > { %v1832_v34 = vmul.f32 1.442695, %v1831_v33 }
 0x8c3   : > { %5046 = vpow2.f32 %v1832_v34 }
 0x8d0   : > { %v5047_v35 = vpop.eup %5046 }
 0x8d1   : > { %v1834_v36 = vsel %vm1073_vm3, %v5047_v35, 0.0 }
 0x8d2   : > { %1835 = vadd.xlane.f32.xlu1 %v1834_v36 }
 0x95b   : > { %v1836_v48 = vpop.xlane.xlu1 %1835 }
 0x95c   : > { %5048 = vrcp.f32 %v1836_v48 }
 0x969   : > { %v5049_v49 = vpop.eup %5048 }
 0x96a   : > { %v1838_v50 = vmul.f32 %v5049_v49, %v5047_v35 }
 0x96c   : > { %v1839_v51 = vpack.c.bf16 %v1838_v50, %v1838_v50 }
 0x96e   : > { %4725 = vmatmul.mubr.msk.bf16.vlgmr.msra.gmra.mxu0 %vm1073_vm3, %v1839_v51  ;;  %v4338_v51 = vld [vmem:[%s5253_s18 + $0xc] sm:$0xf] }
 0x96f   : > { %4738 = vmatprep.mubr.msk.bf16.mxu0 %vm5091_vm1, %v5090_v3  ;;  %4735 = vmatpush3.bf16.msra.mxu0 %v5003_v52  ;;  %v2248_v52 = vsel %vm1138_vm4, %v4338_v51, 0 }
 0x970   : > { %4736 = vmatprep.subr.bf16.mxu0 %v5090_v3 }
 0x973   : > { %4737 = vmatpush3.bf16.msra.mxu0 %v5005_v53 }
 0x974   : > { %4750 = vmatprep.subr.bf16.mxu0 %v5090_v3 }
 0x976   : > { %4739 = vmatmul.mubr.msk.bf16.vlgmr.msra.gmra.mxu0 %vm901_vm2, %v5309_v8 }
 0x977   : > { %4754 = vmatprep.mubr.msk.bf16.mxu0 %vm5091_vm1, %v5090_v3  ;;  %4751 = vmatpush3.bf16.msra.mxu0 %v5006_v28 }
 0x978   : > { %4752 = vmatprep.subr.bf16.mxu0 %v5090_v3 }
 0x97b   : > { %4753 = vmatpush3.bf16.msra.mxu0 %v5007_v29 }
 0x97c   : > { %4764 = vmatprep.subr.bf16.mxu0 %v5090_v3 }
 0x97e   : > { %4755 = vmatmul.mubr.msk.bf16.vlgmr.msra.gmra.mxu0 %vm901_vm2, %v5309_v8 }
 0x97f   : > { %4766 = vmatprep.mubr.msk.bf16.mxu0 %vm5091_vm1, %v5090_v3 }
 0xa2e   : > { %v1881_v54 = vpop.f32.mrf.mxu0 }
 0xa2f   : > { %v1887_v57 = vpack.c.bf16 %v1881_v54, %v1881_v54 }
 0xa30   : > { %v4726_v58 = vpop.f32.mrf.mxu0 }
 0xa31   : > { %4731 = vmatmul.mubr.msk.bf16.vlgmr.msra.gmra.mxu1 %vm1073_vm3, %v1887_v57  ;;  %v5009_v58 = vld [vmem:[%s5895_s28 + $0x8] sm:$0xff]  }
 0xa32   : > { %v1884_v59 = vpop.f32.mrf.mxu0  ;;  %4743 = vmatpush3.bf16.msra.mxu1 %v5002_v55  ;;  %4746 = vmatprep.mubr.msk.bf16.mxu1 %vm5091_vm1, %v5090_v3 }
 0xa33   : > { %4744 = vmatprep.subr.bf16.mxu1 %v5090_v3  ;;  %v5011_v59 = vld [vmem:[%s5895_s28] sm:$0xff]  }
 0xa34   : > { %v4727_v62 = vpop.f32.mrf.mxu0 }
 0xa36   : > { %4745 = vmatpush3.bf16.msra.mxu1 %v5004_v61  ;;  %v1996_v0 = vpop.f32.mrf.mxu0  ;;  %v5542_v61 = vld [vmem:[#allocation2 + $0x8] sm:$0xff] }
 0xa37   : > { %4758 = vmatprep.subr.bf16.mxu1 %v5090_v3  ;;  %v1997_v7 = vadd.f32 %v5508_v20, %v1996_v0  ;;  %v5546_v62 = vpack.c.bf16 %v5542_v61, %v5542_v61 }
 0xa38   : > { %v4740_v1 = vpop.f32.mrf.mxu0 }
 0xa39   : > { %4747 = vmatmul.mubr.msk.bf16.vlgmr.msra.gmra.mxu1 %vm901_vm2, %v5309_v8  ;;  %v2132_v26 = vpack.c.bf16 %v1997_v7, %v1997_v7  ;;  %v5008_v1 = vld [vmem:[%s5223_s30 + $0x8] sm:$0xff]  }
 0xa3a   : > { %4760 = vmatprep.mubr.msk.bf16.mxu1 %vm5091_vm1, %v5090_v3  ;;  %v1999_v4 = vpop.f32.mrf.mxu0 }
 0xa3c   : > { %v4741_v5 = vpop.f32.mrf.mxu0 }
 0xa3e   : > { %v2126_v44 = vpop.f32.mrf.mxu0 }
 0xa3f   : > { %v2127_v45 = vadd.f32 %v5528_v43, %v2126_v44 }
 0xa40   : > { %v4756_v46 = vpop.f32.mrf.mxu0 }
 0xa41   : > { %v2194_v47 = vpack.c.bf16 %v2127_v45, %v2127_v45 }
 0xa42   : > { %v2129_v48 = vpop.f32.mrf.mxu0 }
 0xa43   : > { %v2199_v49 = vsel %vm1138_vm4, %v2194_v47, 0 }
 0xa44   : > { %v4757_v50 = vpop.f32.mrf.mxu0  ;;  %4765 = vmatpush3.bf16.msra.mxu0 %v2199_v49 }
 0xa45   : > { %4776 = vmatprep.subr.bf16.mxu0 %v5090_v3 }
 0xaf1   : > { %v1930_v10 = vpop.f32.mrf.mxu1 }
 0xaf2   : > { %v5501_v11 = vadd.f32 %v1930_v10, %v1578_v6  ;;  %v5010_v10 = vld [vmem:[%s5223_s30] sm:$0xff]  }
 0xaf3   : > { %v4732_v12 = vpop.f32.mrf.mxu1 }
 0xaf5   : > { %v1933_v15 = vpop.f32.mrf.mxu1 }
 0xaf7   : > { %v4733_v16 = vpop.f32.mrf.mxu1 }
 0xaf9   : > { %v2061_v18 = vpop.f32.mrf.mxu1 }
 0xafa   : > { %v2062_v19 = vadd.f32 %v5504_v17, %v2061_v18 }
 0xafb   : > { %v4748_v21 = vpop.f32.mrf.mxu1 }
 0xafc   : > { %v2133_v22 = vpack.c.bf16 %v2062_v19, %v2062_v19 }
 0xafd   : > { %v2064_v24 = vpop.f32.mrf.mxu1 }
 0xafe   : > { %v2138_v56 = vsel %vm1073_vm3, %v2133_v22, 0  ;;  %v5569_v22 = vld [vmem:[%s5899_s27] ss:$0 sm:$0xff]  ;;  %s5903_s27 = sld [smem:[#allocation5_spill]] }
 0xaff   : > { %v4749_v25 = vpop.f32.mrf.mxu1  ;;  %4759 = vmatpush3.bf16.xpose.msra.mxu1 %v2138_v56 }
 0xb00   : > { %4770 = vmatprep.subr.bf16.mxu1 %v5090_v3 }
 0xb04   : > { %p4464_p5 = scmp.ne.s32.totalorder %s5903_s27, 1 }
 0xb05   : > { %s5904_s0 = sld [smem:[#allocation18_spill]] (!%p4464_p5) }
 0xb06   : > { %4761 = vmatmul.mubr.msk.bf16.vlgmr.msra.gmra.mxu1 %vm1073_vm3, %v2132_v26 }
 0xb07   : > { %4772 = vmatprep.mubr.msk.bf16.mxu1 %vm5091_vm1, %v5090_v3  ;;  %4771 = vmatpush3.bf16.msra.mxu1 %v2248_v52 }
 0xb08   : > { %4784 = vmatprep.subr.bf16.mxu1 %v5090_v3 }
 0xbc6   : > { %v2174_v30 = vpop.f32.mrf.mxu1 }
 0xbc7   : > { %v2180_v31 = vmul.f32 0.35355338, %v2174_v30 }
 0xbc8   : > { %v4762_v32 = vpop.f32.mrf.mxu1 }
 0xbc9   : > { %v2181_v33 = vadd.f32 %v2180_v31, %v5345_v27 }
 0xbca   : > { %v2177_v34 = vpop.f32.mrf.mxu1 }
 0xbcb   : > { %v2182_v35 = vsel %vm1073_vm3, %v2181_v33, -inf }
 0xbcc   : > { %2183 = vmax.xlane.f32.xlu0 %v2182_v35  ;;  %v4763_v36 = vpop.f32.mrf.mxu1 }
 0xbcd   : > { %v5012_v36 = vld [vmem:[%s5896_s1 + $0x8] sm:$0xff]  }
 0xc55   : > { %v2184_v38 = vpop.xlane.xlu0 %2183 }
 0xc56   : > { %v2185_v40 = vsub.f32 %v2181_v33, %v2184_v38 }
 0xc58   : > { %v2186_v41 = vmul.f32 1.442695, %v2185_v40 }
 0xc5a   : > { %5050 = vpow2.f32 %v2186_v41 }
 0xc67   : > { %v5051_v8 = vpop.eup %5050 }
 0xc68   : > { %v2188_v42 = vsel %vm1073_vm3, %v5051_v8, 0.0 }
 0xc69   : > { %2189 = vadd.xlane.f32.xlu1 %v2188_v42 }
 0xcf2   : > { %v2190_v53 = vpop.xlane.xlu1 %2189 }
 0xcf3   : > { %5052 = vrcp.f32 %v2190_v53 }
 0xd00   : > { %v5053_v54 = vpop.eup %5052 }
 0xd01   : > { %v2192_v55 = vmul.f32 %v5053_v54, %v5051_v8 }
 0xd03   : > { %v2193_v57 = vpack.c.bf16 %v2192_v55, %v2192_v55 }
 0xd05   : > { %4767 = vmatmul.mubr.msk.bf16.vlgmr.msra.gmra.mxu0 %vm1073_vm3, %v2193_v57 }
 0xd06   : > { %4780 = vmatprep.mubr.msk.bf16.mxu0 %vm5091_vm1, %v5090_v3  ;;  %4777 = vmatpush3.bf16.msra.mxu0 %v5009_v58  ;;  %v5015_v58 = vld [vmem:[%s5895_s28 + $0x18] sm:$0xff]  }
 0xd07   : > { %4778 = vmatprep.subr.bf16.mxu0 %v5090_v3 }
 0xd0a   : > { %4779 = vmatpush3.bf16.msra.mxu0 %v5011_v59  ;;  %v5017_v59 = vld [vmem:[%s5895_s28 + $0x10] sm:$0xff]  }
 0xd0b   : > { %4792 = vmatprep.subr.bf16.mxu0 %v5090_v3 }
 0xd0d   : > { %4781 = vmatmul.mubr.msk.bf16.vlgmr.msra.gmra.mxu0 %vm901_vm2, %v5546_v62 }
 0xd0e   : > { %4796 = vmatprep.mubr.msk.bf16.mxu0 %vm5091_vm1, %v5090_v3  ;;  %4793 = vmatpush3.bf16.msra.mxu0 %v5012_v36 }
 0xd0f   : > { %4794 = vmatprep.subr.bf16.mxu0 %v5090_v3 }
 0xdc5   : > { %v2235_v0 = vpop.f32.mrf.mxu0 }
 0xdc6   : > { %v2241_v4 = vpack.c.bf16 %v2235_v0, %v2235_v0 }
 0xdc7   : > { %v4768_v5 = vpop.f32.mrf.mxu0 }
 0xdc8   : > { %4773 = vmatmul.mubr.msk.bf16.vlgmr.msra.gmra.mxu1 %vm1073_vm3, %v2241_v4  ;;  %v5014_v4 = vld [vmem:[%s5223_s30 + $0x18] sm:$0xff]  }
 0xdc9   : > { %v2238_v6 = vpop.f32.mrf.mxu0  ;;  %4785 = vmatpush3.bf16.msra.mxu1 %v5008_v1  ;;  %4788 = vmatprep.mubr.msk.bf16.mxu1 %vm5091_vm1, %v5090_v3 }
 0xdca   : > { %4786 = vmatprep.subr.bf16.mxu1 %v5090_v3  ;;  %v5016_v6 = vld [vmem:[%s5223_s30 + $0x10] sm:$0xff]  }
 0xdcb   : > { %v4769_v12 = vpop.f32.mrf.mxu0 }
 0xdcd   : > { %4787 = vmatpush3.bf16.msra.mxu1 %v5010_v10  ;;  %v2361_v15 = vpop.f32.mrf.mxu0 }
 0xdce   : > { %4800 = vmatprep.subr.bf16.mxu1 %v5090_v3  ;;  %v2362_v34 = vadd.f32 %v5326_v13, %v2361_v15 }
 0xdcf   : > { %v4782_v16 = vpop.f32.mrf.mxu0 }
 0xdd0   : > { %4789 = vmatmul.mubr.msk.bf16.vlgmr.msra.gmra.mxu1 %vm901_vm2, %v5546_v62  ;;  %v2493_v35 = vpack.c.bf16 %v2362_v34, %v2362_v34 }
 0xdd1   : > { %4802 = vmatprep.mubr.msk.bf16.mxu1 %vm5091_vm1, %v5090_v3  ;;  %v2364_v18 = vpop.f32.mrf.mxu0 }
 0xdd3   : > { %v4783_v19 = vpop.f32.mrf.mxu0 }
 0xe88   : > { %v2284_v21 = vpop.f32.mrf.mxu1 }
 0xe89   : > { %v2290_v24 = vadd.f32 %v2284_v21, %v5501_v11 }
 0xe8a   : > { %v4774_v56 = vpop.f32.mrf.mxu1 }
 0xe8b   : > { %v2298_v7 = vadd.f32 %v5569_v22, %v2290_v24 }
 0xe8c   : > { %v2287_v25 = vpop.f32.mrf.mxu1 }
 0xe8d   : > { %2299 = vst.msk [vmem:[#allocation3] sm:$0xff] %vm901_vm2, %v2298_v7 }
 0xe8e   : > { %v4775_v26 = vpop.f32.mrf.mxu1 }
 0xe90   : > { %v2424_v28 = vpop.f32.mrf.mxu1 }
 0xe91   : > { %v2425_v29 = vadd.f32 %v5322_v9, %v2424_v28  ;;  %v5013_v9 = vld [vmem:[%s5896_s1] sm:$0xff]  }
 0xe92   : > { %v4790_v30 = vpop.f32.mrf.mxu1  ;;  %4795 = vmatpush3.bf16.msra.mxu0 %v5013_v9 }
 0xe93   : > { %v2494_v31 = vpack.c.bf16 %v2425_v29, %v2425_v29  ;;  %4806 = vmatprep.subr.bf16.mxu0 %v5090_v3 }
 0xe94   : > { %v2427_v32 = vpop.f32.mrf.mxu1 }
 0xe95   : > { %v2499_v33 = vsel %vm1073_vm3, %v2494_v31, 0  ;;  %4797 = vmatmul.mubr.msk.bf16.vlgmr.msra.gmra.mxu0 %vm901_vm2, %v5546_v62 }
 0xe96   : > { %v4791_v11 = vpop.f32.mrf.mxu1  ;;  %4801 = vmatpush3.bf16.xpose.msra.mxu1 %v2499_v33  ;;  %4808 = vmatprep.mubr.msk.bf16.mxu0 %vm5091_vm1, %v5090_v3  ;;  %v5018_v33 = vld [vmem:[%s5896_s1 + $0x18] sm:$0xff]  }
 0xe97   : > { %4812 = vmatprep.subr.bf16.mxu1 %v5090_v3 }
 0xe9d   : > { %4803 = vmatmul.mubr.msk.bf16.vlgmr.msra.gmra.mxu1 %vm1073_vm3, %v2493_v35 }
 0xe9e   : > { %4816 = vmatprep.mubr.msk.bf16.mxu1 %vm5091_vm1, %v5090_v3  ;;  %4813 = vmatpush3.bf16.msra.mxu1 %v5015_v58  ;;  %v5020_v58 = vld [vmem:[%s5223_s30 + $0x28] sm:$0xff]  }
 0xe9f   : > { %4814 = vmatprep.subr.bf16.mxu1 %v5090_v3 }
 0xea2   : > { %4815 = vmatpush3.bf16.msra.mxu1 %v5017_v59 }
 0xea3   : > { %4828 = vmatprep.subr.bf16.mxu1 %v5090_v3 }
 0xea5   : > { %4817 = vmatmul.mubr.msk.bf16.vlgmr.msra.gmra.mxu1 %vm901_vm2, %v5546_v62 }
 0xea6   : > { %4832 = vmatprep.mubr.msk.bf16.mxu1 %vm5091_vm1, %v5090_v3  ;;  %4829 = vmatpush3.bf16.msra.mxu1 %v5018_v33 }
 0xea7   : > { %4830 = vmatprep.subr.bf16.mxu1 %v5090_v3 }
 0xf55   : > { %v2487_v50 = vpop.f32.mrf.mxu0 }
 0xf56   : > { %v2488_v51 = vadd.f32 %v5351_v39, %v2487_v50 }
 0xf57   : > { %v4798_v52 = vpop.f32.mrf.mxu0 }
 0xf58   : > { %v2555_v53 = vpack.c.bf16 %v2488_v51, %v2488_v51 }
 0xf59   : > { %v2490_v54 = vpop.f32.mrf.mxu0 }
 0xf5a   : > { %v2560_v55 = vsel %vm1138_vm4, %v2555_v53, 0  ;;  %v2603_v53 = vld [vmem:[%s5253_s18] sm:$0xf] }
 0xf5b   : > { %v4799_v57 = vpop.f32.mrf.mxu0  ;;  %4807 = vmatpush3.bf16.msra.mxu0 %v2560_v55 }
 0xf5c   : > { %4820 = vmatprep.subr.bf16.mxu0 %v5090_v3  ;;  %v2954_v57 = vsel %vm1138_vm4, %v2603_v53, 0 }
 0xf5d   : > { %v2535_v13 = vpop.f32.mrf.mxu1 }
 0xf5e   : > { %v2541_v38 = vmul.f32 0.35355338, %v2535_v13 }
 0xf5f   : > { %v4804_v40 = vpop.f32.mrf.mxu1 }
 0xf60   : > { %v2542_v41 = vadd.f32 %v2541_v38, %v5345_v27 }
 0xf61   : > { %v2538_v8 = vpop.f32.mrf.mxu1 }
 0xf62   : > { %v2543_v42 = vsel %vm1073_vm3, %v2542_v41, -inf }
 0xf63   : > { %2544 = vmax.xlane.f32.xlu0 %v2543_v42  ;;  %v4805_v44 = vpop.f32.mrf.mxu1 }
 0xf65   : > { %v2661_v10 = vpop.f32.mrf.mxu1 }
 0xf66   : > { %v2662_v30 = vadd.f32 %v5382_v2, %v2661_v10  ;;  %v5023_v10 = vld [vmem:[%s5895_s28 + $0x20] sm:$0xff]  }
 0xf67   : > { %v4818_v12 = vpop.f32.mrf.mxu1 }
 0xf68   : > { %v2793_v32 = vpack.c.bf16 %v2662_v30, %v2662_v30 }
 0xf69   : > { %v2664_v15 = vpop.f32.mrf.mxu1 }
 0xf6b   : > { %v4819_v16 = vpop.f32.mrf.mxu1 }
 0xfec   : > { %v2545_v45 = vpop.xlane.xlu0 %2544 }
 0xfed   : > { %v2546_v46 = vsub.f32 %v2542_v41, %v2545_v45 }
 0xfef   : > { %v2547_v47 = vmul.f32 1.442695, %v2546_v46 }
 0xff1   : > { %5054 = vpow2.f32 %v2547_v47 }
 0xffe   : > { %v5055_v48 = vpop.eup %5054 }
 0xfff   : > { %v2549_v49 = vsel %vm1073_vm3, %v5055_v48, 0.0 }
0x1000   : > { %2550 = vadd.xlane.f32.xlu1 %v2549_v49 }
0x1089   : > { %v2551_v39 = vpop.xlane.xlu1 %2550 }
0x108a   : > { %5056 = vrcp.f32 %v2551_v39  ;;  %v5021_v39 = vld [vmem:[%s5223_s30 + $0x20] sm:$0xff]  }
0x1097   : > { %v5057_v0 = vpop.eup %5056 }
0x1098   : > { %v2553_v1 = vmul.f32 %v5057_v0, %v5055_v48 }
0x109a   : > { %v2554_v5 = vpack.c.bf16 %v2553_v1, %v2553_v1  ;;  %v5022_v1 = vld [vmem:[%s5895_s28 + $0x28] sm:$0xff]  }
0x109c   : > { %4809 = vmatmul.mubr.msk.bf16.vlgmr.msra.gmra.mxu0 %vm1073_vm3, %v2554_v5 }
0x109d   : > { %4821 = vmatpush3.bf16.msra.mxu0 %v5014_v4  ;;  %4824 = vmatprep.mubr.msk.bf16.mxu0 %vm5091_vm1, %v5090_v3 }
0x109e   : > { %4822 = vmatprep.subr.bf16.mxu0 %v5090_v3 }
0x10a1   : > { %4823 = vmatpush3.bf16.msra.mxu0 %v5016_v6 }
0x10a2   : > { %4836 = vmatprep.subr.bf16.mxu0 %v5090_v3 }
0x10a4   : > { %4825 = vmatmul.mubr.msk.bf16.vlgmr.msra.gmra.mxu0 %vm901_vm2, %v5546_v62 }
0x10a5   : > { %4838 = vmatprep.mubr.msk.bf16.mxu0 %vm5091_vm1, %v5090_v3 }
0x115c   : > { %v5614_v18 = vpop.f32.mrf.mxu0 }
0x115d   : > { %v2602_v59 = vpack.c.bf16 %v5614_v18, %v5614_v18 }
0x115e   : > { %v4810_v19 = vpop.f32.mrf.mxu0 }
0x1160   : > { %v2599_v21 = vpop.f32.mrf.mxu0 }
0x1162   : > { %v4811_v24 = vpop.f32.mrf.mxu0 }
0x1164   : > { %v2724_v56 = vpop.f32.mrf.mxu0 }
0x1165   : > { %v2725_v7 = vadd.f32 %v5378_v63, %v2724_v56  ;;  %v5019_v63 = vld [vmem:[%s5896_s1 + $0x10] sm:$0xff]  }
0x1166   : > { %v4826_v25 = vpop.f32.mrf.mxu0  ;;  %4831 = vmatpush3.bf16.msra.mxu1 %v5019_v63 }
0x1167   : > { %v2794_v26 = vpack.c.bf16 %v2725_v7, %v2725_v7  ;;  %4842 = vmatprep.subr.bf16.mxu1 %v5090_v3 }
0x1168   : > { %v2727_v28 = vpop.f32.mrf.mxu0 }
0x1169   : > { %v2799_v29 = vsel %vm1073_vm3, %v2794_v26, 0  ;;  %4833 = vmatmul.mubr.msk.bf16.vlgmr.msra.gmra.mxu1 %vm901_vm2, %v5546_v62 }
0x116a   : > { %v4827_v31 = vpop.f32.mrf.mxu0  ;;  %4837 = vmatpush3.bf16.xpose.msra.mxu0 %v2799_v29  ;;  %4844 = vmatprep.mubr.msk.bf16.mxu1 %vm5091_vm1, %v5090_v3 }
0x116b   : > { %4848 = vmatprep.subr.bf16.mxu0 %v5090_v3 }
0x1171   : > { %4839 = vmatmul.mubr.msk.bf16.vlgmr.msra.gmra.mxu0 %vm1073_vm3, %v2793_v32 }
0x1172   : > { %4850 = vmatprep.mubr.msk.bf16.mxu0 %vm5091_vm1, %v5090_v3 }
0x1229   : > { %v2787_v38 = vpop.f32.mrf.mxu1 }
0x122a   : > { %v2788_v40 = vadd.f32 %v5401_v23, %v2787_v38  ;;  %v4384_v23 = vld [vmem:[%s5253_s18 + $0x4] sm:$0xf] }
0x122b   : > { %v4834_v41 = vpop.f32.mrf.mxu1  ;;  %v2908_v50 = vsel %vm1138_vm4, %v4384_v23, 0  ;;  %v5692_v38 = vld [vmem:[%s5897_s3] sm:$0xff] }
0x122c   : > { %v2855_v8 = vpack.c.bf16 %v2788_v40, %v2788_v40  ;;  %4849 = vmatpush3.bf16.msra.mxu0 %v2908_v50 }
0x122d   : > { %v2790_v42 = vpop.f32.mrf.mxu1  ;;  %4860 = vmatprep.subr.bf16.mxu0 %v5090_v3 }
0x122e   : > { %v2860_v44 = vsel %vm1138_vm4, %v2855_v8, 0 }
0x122f   : > { %v4835_v45 = vpop.f32.mrf.mxu1  ;;  %4843 = vmatpush3.bf16.msra.mxu1 %v2860_v44 }
0x1230   : > { %4854 = vmatprep.subr.bf16.mxu1 %v5090_v3 }
0x1231   : > { %v2835_v2 = vpop.f32.mrf.mxu0 }
0x1232   : > { %v2841_v34 = vmul.f32 0.35355338, %v2835_v2 }
0x1233   : > { %v4840_v11 = vpop.f32.mrf.mxu0 }
0x1234   : > { %v2842_v35 = vadd.f32 %v2841_v34, %v5345_v27 }
0x1235   : > { %v2838_v36 = vpop.f32.mrf.mxu0 }
0x1236   : > { %v2843_v9 = vsel %vm1073_vm3, %v2842_v35, -inf  ;;  %v5025_v36 = vld [vmem:[%s5896_s1 + $0x20] sm:$0xff]  }
0x1237   : > { %2844 = vmax.xlane.f32.xlu0 %v2843_v9  ;;  %v4841_v13 = vpop.f32.mrf.mxu0 }
0x12c0   : > { %v2845_v27 = vpop.xlane.xlu0 %2844 }
0x12c1   : > { %v2846_v46 = vsub.f32 %v2842_v35, %v2845_v27  ;;  %v5024_v35 = vld [vmem:[%s5896_s1 + $0x28] sm:$0xff]  }
0x12c3   : > { %v2847_v47 = vmul.f32 1.442695, %v2846_v46 }
0x12c5   : > { %5058 = vpow2.f32 %v2847_v47 }
0x12d2   : > { %v5059_v48 = vpop.eup %5058 }
0x12d3   : > { %v2849_v49 = vsel %vm1073_vm3, %v5059_v48, 0.0 }
0x12d4   : > { %2850 = vadd.xlane.f32.xlu1 %v2849_v49 }
0x135d   : > { %v2851_v51 = vpop.xlane.xlu1 %2850 }
0x135e   : > { %5060 = vrcp.f32 %v2851_v51 }
0x136b   : > { %v5061_v52 = vpop.eup %5060 }
0x136c   : > { %v2853_v54 = vmul.f32 %v5061_v52, %v5059_v48 }
0x136e   : > { %v2854_v55 = vpack.c.bf16 %v2853_v54, %v2853_v54  ;;  %v4416_v54 = vld [vmem:[%s5253_s18 + $0x8] sm:$0xf] }
0x1370   : > { %4845 = vmatmul.mubr.msk.bf16.vlgmr.msra.gmra.mxu1 %vm1073_vm3, %v2854_v55  ;;  %v3300_v55 = vsel %vm1138_vm4, %v4416_v54, 0 }
0x1371   : > { %4855 = vmatpush3.bf16.msra.mxu1 %v2954_v57  ;;  %4856 = vmatprep.mubr.msk.bf16.mxu1 %vm5091_vm1, %v5090_v3 }
0x1372   : > { %4868 = vmatprep.subr.bf16.mxu1 %v5090_v3 }
0x1378   : > { %4857 = vmatmul.mubr.msk.bf16.vlgmr.msra.gmra.mxu1 %vm1073_vm3, %v2602_v59 }
0x1379   : > { %4869 = vmatpush3.bf16.msra.mxu1 %v5020_v58  ;;  %4872 = vmatprep.mubr.msk.bf16.mxu1 %vm5091_vm1, %v5090_v3 }
0x137a   : > { %4870 = vmatprep.subr.bf16.mxu1 %v5090_v3 }
0x137d   : > { %4871 = vmatpush3.bf16.msra.mxu1 %v5021_v39  ;;  %v5027_v39 = vld [vmem:[%s5895_s28 + $0x38] sm:$0xff]  }
0x137e   : > { %4884 = vmatprep.subr.bf16.mxu1 %v5090_v3 }
0x1380   : > { %4873 = vmatmul.mubr.msk.bf16.vlgmr.msra.gmra.mxu1 %vm901_vm2, %v5546_v62 }
0x1381   : > { %4886 = vmatprep.mubr.msk.bf16.mxu1 %vm5091_vm1, %v5090_v3 }
0x1430   : > { %v2896_v0 = vpop.f32.mrf.mxu1 }
0x1431   : > { %v2902_v4 = vpack.c.bf16 %v2896_v0, %v2896_v0  ;;  %v5029_v0 = vld [vmem:[%s5895_s28 + $0x30] sm:$0xff]  }
0x1432   : > { %v4846_v5 = vpop.f32.mrf.mxu1 }
0x1433   : > { %4851 = vmatmul.mubr.msk.bf16.vlgmr.msra.gmra.mxu0 %vm1073_vm3, %v2902_v4  ;;  %v5026_v4 = vld [vmem:[%s5223_s30 + $0x38] sm:$0xff]  }
0x1434   : > { %v2899_v6 = vpop.f32.mrf.mxu1  ;;  %4861 = vmatpush3.bf16.msra.mxu0 %v5022_v1  ;;  %4864 = vmatprep.mubr.msk.bf16.mxu0 %vm5091_vm1, %v5090_v3 }
0x1435   : > { %4862 = vmatprep.subr.bf16.mxu0 %v5090_v3 }
0x1436   : > { %v4847_v12 = vpop.f32.mrf.mxu1 }
0x1437   : > { %v5028_v12 = vld [vmem:[%s5223_s30 + $0x30] sm:$0xff]  }
0x1438   : > { %v5665_v15 = vpop.f32.mrf.mxu1  ;;  %4863 = vmatpush3.bf16.msra.mxu0 %v5023_v10 }
0x1439   : > { %4876 = vmatprep.subr.bf16.mxu0 %v5090_v3 }
0x143a   : > { %v4858_v16 = vpop.f32.mrf.mxu1 }
0x143b   : > { %4865 = vmatmul.mubr.msk.bf16.vlgmr.msra.gmra.mxu0 %vm901_vm2, %v5546_v62 }
0x143c   : > { %v2993_v18 = vpop.f32.mrf.mxu1  ;;  %4880 = vmatprep.mubr.msk.bf16.mxu0 %vm5091_vm1, %v5090_v3  ;;  %4877 = vmatpush3.bf16.msra.mxu0 %v5024_v35 }
0x143d   : > { %4878 = vmatprep.subr.bf16.mxu0 %v5090_v3 }
0x143e   : > { %v4859_v19 = vpop.f32.mrf.mxu1 }
0x1440   : > { %v3116_v21 = vpop.f32.mrf.mxu1  ;;  %4879 = vmatpush3.bf16.msra.mxu0 %v5025_v36 }
0x1441   : > { %v3117_v24 = vadd.f32 %v5443_v60, %v3116_v21  ;;  %4890 = vmatprep.subr.bf16.mxu0 %v5090_v3 }
0x1442   : > { %v4874_v56 = vpop.f32.mrf.mxu1 }
0x1443   : > { %v3186_v7 = vpack.c.bf16 %v3117_v24, %v3117_v24  ;;  %4881 = vmatmul.mubr.msk.bf16.vlgmr.msra.gmra.mxu0 %vm901_vm2, %v5546_v62 }
0x1444   : > { %v3119_v25 = vpop.f32.mrf.mxu1  ;;  %4892 = vmatprep.mubr.msk.bf16.mxu0 %vm5091_vm1, %v5090_v3 }
0x1445   : > { %v3191_v26 = vsel %vm1073_vm3, %v3186_v7, 0 }
0x1446   : > { %v4875_v28 = vpop.f32.mrf.mxu1  ;;  %4885 = vmatpush3.bf16.xpose.msra.mxu1 %v3191_v26 }
0x1447   : > { %4896 = vmatprep.subr.bf16.mxu1 %v5090_v3 }
0x14f3   : > { %v5675_v29 = vpop.f32.mrf.mxu0 }
0x14f4   : > { %v2991_v56 = vadd.f32 %v5665_v15, %v5675_v29  ;;  %v5030_v29 = vld [vmem:[%s5896_s1 + $0x38] sm:$0xff]  }
0x14f5   : > { %v4852_v30 = vpop.f32.mrf.mxu0 }
0x14f7   : > { %v2947_v31 = vpop.f32.mrf.mxu0 }
0x14f9   : > { %v4853_v32 = vpop.f32.mrf.mxu0 }
0x14fb   : > { %v3053_v33 = vpop.f32.mrf.mxu0 }
0x14fc   : > { %v3054_v63 = vadd.f32 %v5451_v14, %v3053_v33 }
0x14fd   : > { %v4866_v60 = vpop.f32.mrf.mxu0 }
0x14fe   : > { %v3185_v2 = vpack.c.bf16 %v3054_v63, %v3054_v63 }
0x14ff   : > { %v3056_v34 = vpop.f32.mrf.mxu0 }
0x1500   : > { %4887 = vmatmul.mubr.msk.bf16.vlgmr.msra.gmra.mxu1 %vm1073_vm3, %v3185_v2 }
0x1501   : > { %v4867_v11 = vpop.f32.mrf.mxu0  ;;  %4898 = vmatprep.mubr.msk.bf16.mxu1 %vm5091_vm1, %v5090_v3  ;;  %4897 = vmatpush3.bf16.msra.mxu1 %v3300_v55 }
0x1502   : > { %4910 = vmatprep.subr.bf16.mxu1 %v5090_v3 }
0x1503   : > { %v3179_v48 = vpop.f32.mrf.mxu0 }
0x1504   : > { %v3180_v49 = vadd.f32 %v5469_v37, %v3179_v48 }
0x1505   : > { %v4882_v23 = vpop.f32.mrf.mxu0 }
0x1506   : > { %v3247_v50 = vpack.c.bf16 %v3180_v49, %v3180_v49 }
0x1507   : > { %v3182_v51 = vpop.f32.mrf.mxu0 }
0x1508   : > { %v3252_v52 = vsel %vm1138_vm4, %v3247_v50, 0 }
0x1509   : > { %v4883_v53 = vpop.f32.mrf.mxu0  ;;  %4891 = vmatpush3.bf16.msra.mxu0 %v3252_v52 }
0x150a   : > { %4902 = vmatprep.subr.bf16.mxu0 %v5090_v3 }
0x15c0   : > { %v3227_v14 = vpop.f32.mrf.mxu1 }
0x15c1   : > { %v3233_v9 = vmul.f32 0.35355338, %v3227_v14  ;;  %v3699_v14 = vld [vmem:[#allocation3] sm:$0xff] }
0x15c2   : > { %v4888_v13 = vpop.f32.mrf.mxu1 }
0x15c3   : > { %v3234_v40 = vadd.f32 %v5692_v38, %v3233_v9 }
0x15c4   : > { %v3230_v41 = vpop.f32.mrf.mxu1 }
0x15c5   : > { %v3235_v8 = vsel %vm1073_vm3, %v3234_v40, -inf  ;;  %v5079_v41 = vld [vmem:[#allocation2] sm:$0xff] }
0x15c6   : > { %3236 = vmax.xlane.f32.xlu0 %v3235_v8  ;;  %v4889_v42 = vpop.f32.mrf.mxu1  ;;  %v3701_v8 = vadd.f32 %v5079_v41, %v3699_v14 }
0x164f   : > { %v3237_v44 = vpop.xlane.xlu0 %3236 }
0x1650   : > { %v3238_v45 = vsub.f32 %v3234_v40, %v3237_v44  ;;  %v3705_v44 = vsel %vm901_vm2, %v3701_v8, 0.0 }
0x1652   : > { %v3239_v27 = vmul.f32 1.442695, %v3238_v45 }
0x1654   : > { %5062 = vpow2.f32 %v3239_v27 }
0x1661   : > { %v5063_v46 = vpop.eup %5062 }
0x1662   : > { %v3241_v47 = vsel %vm1073_vm3, %v5063_v46, 0.0 }
0x1663   : > { %3242 = vadd.xlane.f32.xlu1 %v3241_v47 }
0x16ec   : > { %v3243_v57 = vpop.xlane.xlu1 %3242 }
0x16ed   : > { %5064 = vrcp.f32 %v3243_v57 }
0x16fa   : > { %v5065_v37 = vpop.eup %5064 }
0x16fb   : > { %v3245_v58 = vmul.f32 %v5065_v37, %v5063_v46 }
0x16fd   : > { %v3246_v59 = vpack.c.bf16 %v3245_v58, %v3245_v58  ;;  %v4447_v58 = vld [vmem:[%s5253_s18 + $0xc] sm:$0xf]  ;;  %s5900_s18 = scalar_lea.vmem %s5849_s10, %s5211_s23 }
0x16ff   : > { %4893 = vmatmul.mubr.msk.bf16.vlgmr.msra.gmra.mxu0 %vm1073_vm3, %v3246_v59  ;;  %v3647_v59 = vsel %vm1138_vm4, %v4447_v58, 0 }
0x1700   : > { %4906 = vmatprep.mubr.msk.bf16.mxu0 %vm5091_vm1, %v5090_v3  ;;  %4903 = vmatpush3.bf16.msra.mxu0 %v5027_v39 }
0x1701   : > { %4904 = vmatprep.subr.bf16.mxu0 %v5090_v3 }
0x1704   : > { %4905 = vmatpush3.bf16.msra.mxu0 %v5029_v0 }
0x1705   : > { %4918 = vmatprep.subr.bf16.mxu0 %v5090_v3 }
0x1707   : > { %4907 = vmatmul.mubr.msk.bf16.vlgmr.msra.gmra.mxu0 %vm901_vm2, %v5546_v62 }
0x1708   : > { %4922 = vmatprep.mubr.msk.bf16.mxu0 %vm5091_vm1, %v5090_v3  ;;  %4919 = vmatpush3.bf16.msra.mxu0 %v5030_v29 }
0x1709   : > { %4920 = vmatprep.subr.bf16.mxu0 %v5090_v3 }
0x17bf   : > { %v3288_v1 = vpop.f32.mrf.mxu0 }
0x17c0   : > { %v3294_v5 = vpack.c.bf16 %v3288_v1, %v3288_v1 }
0x17c1   : > { %v4894_v6 = vpop.f32.mrf.mxu0 }
0x17c2   : > { %4899 = vmatmul.mubr.msk.bf16.vlgmr.msra.gmra.mxu1 %vm1073_vm3, %v3294_v5 }
0x17c3   : > { %v3291_v10 = vpop.f32.mrf.mxu0  ;;  %4911 = vmatpush3.bf16.msra.mxu1 %v5026_v4  ;;  %4914 = vmatprep.mubr.msk.bf16.mxu1 %vm5091_vm1, %v5090_v3 }
0x17c4   : > { %4912 = vmatprep.subr.bf16.mxu1 %v5090_v3 }
0x17c5   : > { %v4895_v16 = vpop.f32.mrf.mxu0 }
0x17c7   : > { %4913 = vmatpush3.bf16.msra.mxu1 %v5028_v12  ;;  %v3400_v18 = vpop.f32.mrf.mxu0 }
0x17c8   : > { %4926 = vmatprep.subr.bf16.mxu1 %v5090_v3  ;;  %v3401_v34 = vadd.f32 %v5508_v20, %v3400_v18 }
0x17c9   : > { %v4908_v19 = vpop.f32.mrf.mxu0 }
0x17ca   : > { %4915 = vmatmul.mubr.msk.bf16.vlgmr.msra.gmra.mxu1 %vm901_vm2, %v5546_v62  ;;  %v3532_v15 = vpack.c.bf16 %v3401_v34, %v3401_v34 }
0x17cb   : > { %4928 = vmatprep.mubr.msk.bf16.mxu1 %vm5091_vm1, %v5090_v3  ;;  %v3403_v21 = vpop.f32.mrf.mxu0 }
0x17cd   : > { %v4909_v24 = vpop.f32.mrf.mxu0 }
0x1882   : > { %v3336_v7 = vpop.f32.mrf.mxu1 }
0x1883   : > { %v5727_v25 = vadd.f32 %v3336_v7, %v2991_v56 }
0x1884   : > { %v4900_v26 = vpop.f32.mrf.mxu1 }
0x1886   : > { %v3339_v28 = vpop.f32.mrf.mxu1 }
0x1888   : > { %v4901_v30 = vpop.f32.mrf.mxu1 }
0x188a   : > { %v3463_v31 = vpop.f32.mrf.mxu1 }
0x188b   : > { %v3464_v32 = vadd.f32 %v5504_v17, %v3463_v31  ;;  %v5031_v17 = vld [vmem:[%s5896_s1 + $0x30] sm:$0xff]  }
0x188c   : > { %v4916_v33 = vpop.f32.mrf.mxu1  ;;  %4921 = vmatpush3.bf16.msra.mxu0 %v5031_v17 }
0x188d   : > { %v3533_v63 = vpack.c.bf16 %v3464_v32, %v3464_v32  ;;  %4932 = vmatprep.subr.bf16.mxu0 %v5090_v3 }
0x188e   : > { %v3466_v60 = vpop.f32.mrf.mxu1 }
0x188f   : > { %v3538_v2 = vsel %vm1073_vm3, %v3533_v63, 0  ;;  %4923 = vmatmul.mubr.msk.bf16.vlgmr.msra.gmra.mxu0 %vm901_vm2, %v5546_v62  ;;  %v5033_v63 = vld [vmem:[%s5266_s7] sm:$0xff]   ;;  %v5034_v60 = vld [vmem:[%s5276_s9 + $0x18] sm:$0xff]  }
0x1890   : > { %v4917_v11 = vpop.f32.mrf.mxu1  ;;  %4927 = vmatpush3.bf16.xpose.msra.mxu1 %v3538_v2  ;;  %4934 = vmatprep.mubr.msk.bf16.mxu0 %vm5091_vm1, %v5090_v3 }
0x1891   : > { %4938 = vmatprep.subr.bf16.mxu1 %v5090_v3 }
0x1897   : > { %4929 = vmatmul.mubr.msk.bf16.vlgmr.msra.gmra.mxu1 %vm1073_vm3, %v3532_v15 }
0x1898   : > { %4940 = vmatprep.mubr.msk.bf16.mxu1 %vm5091_vm1, %v5090_v3  ;;  %4939 = vmatpush3.bf16.msra.mxu1 %v3647_v59 }
0x1899   : > { %4952 = vmatprep.subr.bf16.mxu1 %v5090_v3 }
0x194f   : > { %v3526_v51 = vpop.f32.mrf.mxu0 }
0x1950   : > { %v3527_v55 = vadd.f32 %v5528_v43, %v3526_v51 }
0x1951   : > { %v4924_v52 = vpop.f32.mrf.mxu0 }
0x1952   : > { %v3594_v57 = vpack.c.bf16 %v3527_v55, %v3527_v55 }
0x1953   : > { %v3529_v53 = vpop.f32.mrf.mxu0 }
0x1954   : > { %v3599_v37 = vsel %vm1138_vm4, %v3594_v57, 0 }
0x1955   : > { %v4925_v54 = vpop.f32.mrf.mxu0  ;;  %4933 = vmatpush3.bf16.msra.mxu0 %v3599_v37 }
0x1956   : > { %4944 = vmatprep.subr.bf16.mxu0 %v5090_v3 }
0x1957   : > { %v3574_v20 = vpop.f32.mrf.mxu1 }
0x1958   : > { %v3580_v35 = vmul.f32 0.35355338, %v3574_v20 }
0x1959   : > { %v4930_v36 = vpop.f32.mrf.mxu1 }
0x195a   : > { %v3581_v9 = vadd.f32 %v5692_v38, %v3580_v35  ;;  %v4450_v35 = vld [vmem:[%s5900_s18] ss:$0 sm:$0xff]  ;;  %s5905_s18 = sld [smem:[#allocation19_spill]] (!%p4464_p5) }
0x195b   : > { %v3577_v13 = vpop.f32.mrf.mxu1 }
0x195c   : > { %v3582_v40 = vsel %vm1073_vm3, %v3581_v9, -inf  ;;  %v4451_v13 = vld [vmem:[%s5901_s24] ss:$0 sm:$0xff]  ;;  %s5906_s24 = sld [smem:[#allocation20_spill]] (!%p4464_p5) }
0x195d   : > { %3583 = vmax.xlane.f32.xlu0 %v3582_v40  ;;  %v4931_v42 = vpop.f32.mrf.mxu1 }
0x1961   : > { %3706 = vadd.xlane.f32.xlu0 %v3705_v44  ;;  %v5035_v44 = vld [vmem:[%s5276_s9 + $0x10] sm:$0xff]  }
0x19e6   : > { %v3584_v62 = vpop.xlane.xlu0 %3583 }
0x19e7   : > { %v3585_v45 = vsub.f32 %v3581_v9, %v3584_v62  ;;  %v5036_v62 = vld [vmem:[%s5276_s9 + $0x8] sm:$0xff]  }
0x19e9   : > { %v3586_v27 = vmul.f32 1.442695, %v3585_v45  ;;  %v5037_v45 = vld [vmem:[%s5276_s9] sm:$0xff]  }
0x19ea   : > { %v3707_v46 = vpop.xlane.xlu0 %3706 }
0x19eb   : > { %5066 = vpow2.f32 %v3586_v27  ;;  %v3712_v47 = vmul.f32 0.03125, %v3707_v46  ;;  %v4452_v27 = vld [vmem:[%s5902_s5] ss:$0 sm:$0xff] }
0x19ed   : > { %v5747_v48 = vsub.f32 %v3701_v8, %v3712_v47 }
0x19ef   : > { %v3716_v38 = vmul.f32 %v5747_v48, %v5747_v48 }
0x19f1   : > { %v3718_v49 = vsel %vm901_vm2, %v3716_v38, 0.0 }
0x19f2   : > { %3719 = vadd.xlane.f32.xlu0 %v3718_v49 }
0x19f8   : > { %v5067_v23 = vpop.eup %5066 }
0x19f9   : > { %v3588_v50 = vsel %vm1073_vm3, %v5067_v23, 0.0 }
0x19fa   : > { %3589 = vadd.xlane.f32.xlu1 %v3588_v50 }
0x1a83   : > { %v3590_v39 = vpop.xlane.xlu1 %3589 }
0x1a84   : > { %5068 = vrcp.f32 %v3590_v39 }
0x1a91   : > { %v5069_v0 = vpop.eup %5068 }
0x1a92   : > { %v3592_v1 = vmul.f32 %v5069_v0, %v5067_v23 }
0x1a94   : > { %v3593_v4 = vpack.c.bf16 %v3592_v1, %v3592_v1 }
0x1a96   : > { %4935 = vmatmul.mubr.msk.bf16.vlgmr.msra.gmra.mxu0 %vm1073_vm3, %v3593_v4 }
0x1a97   : > { %4948 = vmatprep.mubr.msk.bf16.mxu0 %vm5091_vm1, %v5090_v3 }
0x1b56   : > { %v3635_v43 = vpop.f32.mrf.mxu0 }
0x1b57   : > { %v3641_v5 = vpack.c.bf16 %v3635_v43, %v3635_v43 }
0x1b58   : > { %v4936_v6 = vpop.f32.mrf.mxu0 }
0x1b59   : > { %4941 = vmatmul.mubr.msk.bf16.vlgmr.msra.gmra.mxu1 %vm1073_vm3, %v3641_v5 }
0x1b5a   : > { %v3638_v10 = vpop.f32.mrf.mxu0  ;;  %4960 = vmatprep.mubr.msk.bf16.mxu1 %vm5091_vm1, %v5090_v3  ;;  %4953 = vmatpush3.bf16.msra.mxu1 %v5034_v60 }
0x1b5b   : > { %4954 = vmatprep.subr.bf16.mxu1 %v5090_v3 }
0x1b5c   : > { %v4937_v12 = vpop.f32.mrf.mxu0 }
0x1b5e   : > { %4955 = vmatpush3.bf16.msra.mxu1 %v5035_v44 }
0x1b5f   : > { %4956 = vmatprep.subr.bf16.mxu1 %v5090_v3 }
0x1b62   : > { %4957 = vmatpush3.bf16.msra.mxu1 %v5036_v62 }
0x1b63   : > { %4958 = vmatprep.subr.bf16.mxu1 %v5090_v3 }
0x1b66   : > { %4959 = vmatpush3.bf16.msra.mxu1 %v5037_v45 }
0x1c19   : > { %v3683_v16 = vpop.f32.mrf.mxu1 }
0x1c1a   : > { %v3689_v18 = vadd.f32 %v3683_v16, %v5727_v25 }
0x1c1b   : > { %v4942_v19 = vpop.f32.mrf.mxu1 }
0x1c1c   : > { %v3697_v21 = vadd.f32 %v5569_v22, %v3689_v18  ;;  %v5032_v22 = vld [vmem:[%s5266_s7 + $0x8] sm:$0xff]  }
0x1c1d   : > { %v3686_v24 = vpop.f32.mrf.mxu1  ;;  %4945 = vmatpush3.bf16.msra.mxu0 %v5032_v22 }
0x1c1e   : > { %3698 = vst.msk [vmem:[#allocation3 + $0x8] sm:$0xff] %vm901_vm2, %v3697_v21  ;;  %4946 = vmatprep.subr.bf16.mxu0 %v5090_v3  ;;  %v4456_v3 = vld [vmem:[%s857_s6] ss:$0 sm:$0xff] }
0x1c1f   : > { %v4943_v56 = vpop.f32.mrf.mxu1 }
0x1c21   : > { %4947 = vmatpush3.bf16.msra.mxu0 %v5033_v63 }
0x1c25   : > { %v3700_v7 = vld [vmem:[#allocation3 + $0x8] sm:$0xff] }
0x1c26   : > { %v3702_v26 = vadd.f32 %v3700_v7, %v5542_v61  ;;  %v3720_v61 = vpop.xlane.xlu0 %3719 }
0x1c27   : > { %v3724_v2 = vmul.f32 0.03125, %v3720_v61 }
0x1c28   : > { %v3708_v28 = vsel %vm901_vm2, %v3702_v26, 0.0 }
0x1c29   : > { %3709 = vadd.xlane.f32.xlu1 %v3708_v28  ;;  %v3726_v34 = vadd.f32 1e-05, %v3724_v2 }
0x1c2b   : > { %5070 = vrsqrt.f32 %v3726_v34 }
0x1c38   : > { %v5071_v17 = vpop.eup %5070 }
0x1c39   : > { %v3730_v20 = vmul.f32 %v5071_v17, %v5747_v48 }
0x1c3b   : > { %v3738_v9 = vmul.f32 %v4450_v35, %v3730_v20 }
0x1c3d   : > { %v3746_v41 = vadd.f32 %v4451_v13, %v3738_v9 }
0x1cb2   : > { %v3710_v30 = vpop.xlane.xlu1 %3709 }
0x1cb3   : > { %v3713_v31 = vmul.f32 0.03125, %v3710_v30 }
0x1cb5   : > { %v3715_v32 = vsub.f32 %v3702_v26, %v3713_v31 }
0x1cb7   : > { %v3717_v25 = vmul.f32 %v3715_v32, %v3715_v32 }
0x1cb9   : > { %v3721_v33 = vsel %vm901_vm2, %v3717_v25, 0.0 }
0x1cba   : > { %3722 = vadd.xlane.f32.xlu1 %v3721_v33  ;;  %v4463_v33 = vld [vmem:[%s863_s25] ss:$0 sm:$0xff] }
0x1d43   : > { %v3723_v11 = vpop.xlane.xlu1 %3722 }
0x1d44   : > { %v3725_v15 = vmul.f32 0.03125, %v3723_v11 }
0x1d46   : > { %v3727_v29 = vadd.f32 1e-05, %v3725_v15 }
0x1d48   : > { %5072 = vrsqrt.f32 %v3727_v29 }
0x1d55   : > { %v5073_v36 = vpop.eup %5072 }
0x1d56   : > { %v3731_v14 = vmul.f32 %v5073_v36, %v3715_v32  ;;  %v4462_v32 = vld [vmem:[%s860_s2] ss:$0 sm:$0xff] }
0x1d58   : > { %v3739_v40 = vmul.f32 %v4450_v35, %v3731_v14 }
0x1d5a   : > { %v3747_v8 = vadd.f32 %v4451_v13, %v3739_v40 }
0x1d5c   : > { %v3748_v42 = vpack.c.bf16 %v3747_v8, %v3746_v41 }
0x1d5e   : > { %4949 = vmatmul.mubr.msk.bf16.vlgmr.msra.gmra.mxu0 %vm901_vm2, %v3748_v42 }
0x1e1e   : > { %v3809_v46 = vpop.f32.mrf.mxu0 }
0x1e1f   : > { %v3810_v48 = vadd.f32 %v4452_v27, %v3809_v46 }
0x1e20   : > { %v4950_v47 = vpop.f32.mrf.mxu0 }
0x1e21   : > { %v3816_v50 = vmax.f32 %v3810_v48, 0.0 }
0x1e22   : > { %v3812_v38 = vpop.f32.mrf.mxu0 }
0x1e23   : > { %v3813_v49 = vadd.f32 %v4452_v27, %v3812_v38 }
0x1e24   : > { %v4951_v23 = vpop.f32.mrf.mxu0 }
0x1e25   : > { %v3817_v51 = vmax.f32 %v3813_v49, 0.0 }
0x1e27   : > { %v3818_v52 = vpack.c.bf16 %v3817_v51, %v3816_v50 }
0x1e29   : > { %4961 = vmatmul.mubr.msk.bf16.vlgmr.msra.gmra.mxu1 %vm3858_vm5, %v3818_v52 }
0x1ee9   : > { %v3896_v53 = vpop.f32.mrf.mxu1 }
0x1eea   : > { %v3897_v54 = vadd.f32 %v4456_v3, %v3896_v53 }
0x1eeb   : > { %v4962_v55 = vpop.f32.mrf.mxu1 }
0x1eec   : > { %v3903_v57 = vadd.f32 %v3897_v54, %v3746_v41 }
0x1eed   : > { %v3899_v37 = vpop.f32.mrf.mxu1 }
0x1eee   : > { %v3900_v58 = vadd.f32 %v4456_v3, %v3899_v37  ;;  %v3907_v59 = vsel %vm901_vm2, %v3903_v57, 0.0 }
0x1eef   : > { %3908 = vadd.xlane.f32.xlu0 %v3907_v59  ;;  %v4963_v39 = vpop.f32.mrf.mxu1 }
0x1ef0   : > { %v3904_v0 = vadd.f32 %v3900_v58, %v3747_v8 }
0x1ef2   : > { %v3910_v1 = vsel %vm901_vm2, %v3904_v0, 0.0 }
0x1ef3   : > { %3911 = vadd.xlane.f32.xlu1 %v3910_v1 }
0x1f78   : > { %v3909_v4 = vpop.xlane.xlu0 %3908 }
0x1f79   : > { %v3913_v43 = vmul.f32 0.03125, %v3909_v4 }
0x1f7b   : > { %v3915_v5 = vsub.f32 %v3903_v57, %v3913_v43 }
0x1f7c   : > { %v3912_v6 = vpop.xlane.xlu1 %3911 }
0x1f7d   : > { %v3914_v10 = vmul.f32 0.03125, %v3912_v6  ;;  %v3917_v12 = vmul.f32 %v3915_v5, %v3915_v5 }
0x1f7f   : > { %v3916_v16 = vsub.f32 %v3904_v0, %v3914_v10  ;;  %v3919_v18 = vsel %vm901_vm2, %v3917_v12, 0.0 }
0x1f80   : > { %3920 = vadd.xlane.f32.xlu0 %v3919_v18 }
0x1f81   : > { %v3918_v19 = vmul.f32 %v3916_v16, %v3916_v16 }
0x1f83   : > { %v3922_v21 = vsel %vm901_vm2, %v3918_v19, 0.0 }
0x1f84   : > { %3923 = vadd.xlane.f32.xlu1 %v3922_v21 }
0x2009   : > { %v3921_v24 = vpop.xlane.xlu0 %3920 }
0x200a   : > { %v3925_v56 = vmul.f32 0.03125, %v3921_v24 }
0x200c   : > { %v3927_v7 = vadd.f32 1e-05, %v3925_v56 }
0x200d   : > { %v3924_v26 = vpop.xlane.xlu1 %3923 }
0x200e   : > { %5074 = vrsqrt.f32 %v3927_v7  ;;  %v3926_v28 = vmul.f32 0.03125, %v3924_v26 }
0x2010   : > { %v3928_v30 = vadd.f32 1e-05, %v3926_v28 }
0x2012   : > { %5076 = vrsqrt.f32 %v3928_v30 }
0x201b   : > { %v5075_v31 = vpop.eup %5074 }
0x201c   : > { %v3931_v25 = vmul.f32 %v5075_v31, %v3915_v5 }
0x201e   : > { %v3939_v22 = vmul.f32 %v4462_v32, %v3931_v25 }
0x201f   : > { %v5077_v63 = vpop.eup %5076 }
0x2020   : > { %v3947_v60 = vadd.f32 %v4463_v33, %v3939_v22  ;;  %v3932_v61 = vmul.f32 %v5077_v63, %v3916_v16 }
0x2022   : > { %3949 = vst.msk [vmem:[#allocation2] sm:$0xff] %vm901_vm2, %v3947_v60  ;;  %v3940_v2 = vmul.f32 %v4462_v32, %v3932_v61  ;;  %3954 = sbr.rel (%p4464_p5) target bundleno = 8440 (0x20f8), region = 108 }
0x2024   : > { %v3948_v34 = vadd.f32 %v4463_v33, %v3940_v2 }
0x2026   : > { %3950 = vst.msk [vmem:[#allocation2 + $0x8] sm:$0xff] %vm901_vm2, %v3948_v34 }
0x2027   : > { %v5080_v11 = vld [vmem:[%s5904_s0 + $0x8] sm:$0xff]   ;;  %v5092_v15 = vmov 0.0   ;;  %v5081_v29 = vld [vmem:[%s5904_s0] sm:$0xff]   ;;  %vm5093_vm6 = vmmov 0   ;;  %v3955_v17 = vpack.c.bf16 %v3948_v34, %v3947_v60 }
0x2028   : > { %4964 = vmatprep.subr.bf16.mxu0 %v5092_v15  ;;  %4968 = vmatprep.mubr.msk.bf16.mxu0 %vm5093_vm6, %v5092_v15  ;;  %v4465_v20 = vld [vmem:[%s5905_s18] ss:$0 sm:$0xff] }
0x2029   : > { %4965 = vmatpush3.bf16.msra.mxu0 %v5080_v11 }
0x202a   : > { %4966 = vmatprep.subr.bf16.mxu0 %v5092_v15 }
0x202d   : > { %4967 = vmatpush3.bf16.msra.mxu0 %v5081_v29 }
0x2030   : > { %4969 = vmatmul.mubr.msk.bf16.vlgmr.msra.gmra.mxu0 %vm901_vm2, %v3955_v17 }
0x20f0   : > { %v4016_v35 = vpop.f32.mrf.mxu0 }
0x20f1   : > { %v4017_v36 = vadd.f32 %v4465_v20, %v4016_v35 }
0x20f2   : > { %v4970_v14 = vpop.f32.mrf.mxu0 }
0x20f3   : > { %4023 = vst [vmem:[%s5906_s24] sm:$0xff] %v4017_v36 }
0x20f4   : > { %v4019_v9 = vpop.f32.mrf.mxu0 }
0x20f5   : > { %v4020_v13 = vadd.f32 %v4465_v20, %v4019_v9 }
0x20f6   : > { %v4971_v40 = vpop.f32.mrf.mxu0 }
0x20f7   : > { %4024 = vst [vmem:[%s5906_s24 + $0x8] sm:$0xff] %v4020_v13 }
0x20f8 PF: > { %s5907_s5 = sld [smem:[#allocation4_spill]] }
0x20fe   : > { %s30_s1 = sadd.s32 1, %s5907_s5  }
0x20ff   : > { %p27_p6 = scmp.ge.s32.totalorder %s30_s1, 4  }
0x2101   :  { %29 = sbr.rel (!%p27_p6) target bundleno = 14 (0xe), region = 200 }

</bundles_post_ra>
